<compile_context>
chip_gen: v6e
topology: v6e:2x2x1
jax: 0.10.0
libtpu: 0.0.40
codegen_flags: <defaults>
</compile_context>

<pallas_src>
import numpy as np
import jax
import jax.numpy as jnp
from jax.experimental import pallas as pl
from jax.experimental.pallas import tpu as pltpu


BASE_WIDTH = 8
LAYER_PLANES = (8, 16, 32, 64)
LAYER_STRIDES = (1, 2, 2, 2)
NUM_CLASSES = 10
LANE = 128  # lane-dense padded logits width


def _ceil_to(n, m):
    return (n + m - 1) // m * m


# --------------------------------------------------------------------------
# Parameters (PyTorch layouts: conv [Cout, Cin, kh, kw], fc [out, in]).
# --------------------------------------------------------------------------
def _conv_w(key, cout, cin, kh, kw):
    fan_in = cin * kh * kw
    return jax.random.normal(key, (cout, cin, kh, kw), jnp.float32) * (2.0 / fan_in) ** 0.5


def init_params(key):
    keys = iter(jax.random.split(key, 32))
    params = {"conv1": _conv_w(next(keys), BASE_WIDTH, 3, 7, 7), "blocks": []}
    inplanes = BASE_WIDTH
    for planes, stride in zip(LAYER_PLANES, LAYER_STRIDES):
        blk = {
            "stride": stride,
            "conv1_w": _conv_w(next(keys), planes, inplanes, 3, 3),
            "conv2_w": _conv_w(next(keys), planes, planes, 3, 3),
        }
        if stride != 1 or inplanes != planes:
            blk["down_w"] = _conv_w(next(keys), planes, inplanes, 1, 1)
        params["blocks"].append(blk)
        inplanes = planes
    params["fc_w"] = jax.random.normal(next(keys), (NUM_CLASSES, inplanes), jnp.float32) * (1.0 / inplanes) ** 0.5
    params["fc_b"] = jnp.zeros((NUM_CLASSES,), jnp.float32)
    return params


# --------------------------------------------------------------------------
# Host-side operator construction (pure numpy, runs once at build time).
# Batch-stacked activation layout per grid step:  A[b*H + h, w*C + c],
# rows zero-padded at the end to a multiple of 8.
# --------------------------------------------------------------------------
def _conv_ops(w, H, W, B, stride, pad):
    """conv(A) = concat_taps(Lcat @ A) @ Kcat  (stride + zero padding handled).

    Lcat is a tap-stacked, batch-block-diagonal 0/1 row selector
    [ntaps*Mo, Rin]; Kcat is the tap-stacked dense weight operator
    [ntaps*W*Cin, Wo*Cout] shared across the batch."""
    cout, cin, kh, kw = w.shape
    Ho = (H + 2 * pad - kh) // stride + 1
    Wo = (W + 2 * pad - kw) // stride + 1
    Rin = max(8, _ceil_to(B * H, 8))
    Mo = max(8, _ceil_to(B * Ho, 8))
    Ls, Ks = [], []
    for dh in range(kh):
        L = np.zeros((Mo, Rin), np.float32)
        valid = False
        for b in range(B):
            for ho in range(Ho):
                hi = stride * ho + dh - pad
                if 0 <= hi < H:
                    L[b * Ho + ho, b * H + hi] = 1.0
                    valid = True
        if not valid:
            continue  # this kernel row only ever reads zero padding
        K = np.zeros((W * cin, Wo * cout), np.float32)
        for wo in range(Wo):
            for dw in range(kw):
                wi = stride * wo + dw - pad
                if 0 <= wi < W:
                    K[wi * cin:(wi + 1) * cin, wo * cout:(wo + 1) * cout] = w[:, :, dh, dw].T
        Ls.append(L)
        Ks.append(K)
    Lcat = np.concatenate(Ls, axis=0)  # [ntaps*Mo, Rin]
    Kcat = np.concatenate(Ks, axis=0)  # [ntaps*W*Cin, Wo*Cout]
    return Lcat, Kcat, len(Ls), Mo, Ho, Wo


def _maxpool_ops(H, W, C, B, k=3, stride=2, pad=1):
    """Separable 3x3/s2/p1 max pool.  Column taps fused into one right matmul,
    row taps fused into one block-diagonal left matmul; VPU max over taps.
    NOTE: zero fill stands in for -inf padding ONLY because the pooled input
    is post-ReLU (>= 0)."""
    Ho = (H + 2 * pad - k) // stride + 1
    Wo = (W + 2 * pad - k) // stride + 1
    Rin = max(8, _ceil_to(B * H, 8))
    Rout = max(8, _ceil_to(B * Ho, 8))
    eye = np.eye(C, dtype=np.float32)
    Rcols, Lrows = [], []
    for d in range(k):
        Rd = np.zeros((W * C, Wo * C), np.float32)
        any_c = False
        for wo in range(Wo):
            wi = stride * wo + d - pad
            if 0 <= wi < W:
                Rd[wi * C:(wi + 1) * C, wo * C:(wo + 1) * C] = eye
                any_c = True
        if any_c:
            Rcols.append(Rd)
        Ld = np.zeros((Rout, Rin), np.float32)
        any_r = False
        for b in range(B):
            for ho in range(Ho):
                hi = stride * ho + d - pad
                if 0 <= hi < H:
                    Ld[b * Ho + ho, b * H + hi] = 1.0
                    any_r = True
        if any_r:
            Lrows.append(Ld)
    Rcat = np.concatenate(Rcols, axis=1)  # [W*C, ncol*Wo*C]
    Lcat = np.concatenate(Lrows, axis=0)  # [nrow*Rout, Rin]
    return Rcat, Lcat, len(Rcols), len(Lrows), Wo * C, Rout, Ho, Wo


def _head_ops(H, W, C, B, fc_w, fc_b):
    """Global avgpool + fc, with the width-average operator folded into the
    (lane-padded) fc weights:  logits = (SL @ A) @ headR + bias."""
    Rin = max(8, _ceil_to(B * H, 8))
    Rfeat = max(8, _ceil_to(B, 8))
    SL = np.zeros((Rfeat, Rin), np.float32)
    for b in range(B):
        for h in range(H):
            SL[b, b * H + h] = 1.0 / H
    SR = np.zeros((W * C, C), np.float32)
    eye = np.eye(C, dtype=np.float32) / W
    for w in range(W):
        SR[w * C:(w + 1) * C, :] = eye
    fcT = np.zeros((C, LANE), np.float32)
    fcT[:, :NUM_CLASSES] = np.asarray(fc_w, np.float32).T
    headR = SR @ fcT  # [W*C, 128]
    bias = np.zeros((1, LANE), np.float32)
    bias[0, :NUM_CLASSES] = np.asarray(fc_b, np.float32)
    return SL, headR, bias, Rfeat


# --------------------------------------------------------------------------
# Fused kernel: whole forward, one grid step == one batch tile of images.
# --------------------------------------------------------------------------
def _make_kernel(meta):
    f32, bf16 = jnp.float32, jnp.bfloat16

    def conv(a, l_ref, k_ref, ntaps, mo):
        # 1) tap-stacked row selection (one matmul), exact 0/1 gather.
        rows = jnp.dot(l_ref[...], a, preferred_element_type=f32)     # [ntaps*mo, WC]
        # 2) relayout tap blocks onto the contraction axis (aligned sublane
        #    slices + lane concat), then ONE fat-contraction weight matmul.
        if ntaps > 1:
            rows = jnp.concatenate(
                [rows[t * mo:(t + 1) * mo, :] for t in range(ntaps)], axis=1)
        return jnp.dot(rows.astype(bf16), k_ref[...], preferred_element_type=f32)

    def kernel(*refs):
        it = iter(refs)
        x_ref = next(it)
        c1_l, c1_k = next(it), next(it)
        mp_r, mp_l = next(it), next(it)
        blk_refs = [[next(it) for _ in range(6 if bm["down"] else 4)]
                    for bm in meta["blocks"]]
        sl_ref, head_ref, bias_ref = next(it), next(it), next(it)
        out_ref = next(it)

        # conv1 + relu
        nt, mo = meta["conv1"]
        a = jnp.maximum(conv(x_ref[...], c1_l, c1_k, nt, mo), 0.0).astype(bf16)

        # maxpool 3x3 / stride 2 / pad 1 (input is post-ReLU, so zero fill is safe)
        ncol, nrow, woc, rout = meta["pool"]
        cols = jnp.dot(a, mp_r[...], preferred_element_type=f32)      # [Rin, ncol*woc]
        m = cols[:, 0:woc]
        for t in range(1, ncol):
            m = jnp.maximum(m, cols[:, t * woc:(t + 1) * woc])
        rows = jnp.dot(mp_l[...], m.astype(bf16), preferred_element_type=f32)  # [nrow*rout, woc]
        p = rows[0:rout, :]
        for t in range(1, nrow):
            p = jnp.maximum(p, rows[t * rout:(t + 1) * rout, :])
        a = p.astype(bf16)

        # layer1..layer4 (basic residual blocks)
        for bm, br in zip(meta["blocks"], blk_refs):
            nt1, mo1 = bm["c1"]
            nt2, mo2 = bm["c2"]
            out1 = jnp.maximum(conv(a, br[0], br[1], nt1, mo1), 0.0)
            if bm["down"]:
                ntd, mod = bm["down"]
                identity = conv(a, br[4], br[5], ntd, mod)
            else:
                identity = a.astype(f32)
            out2 = conv(out1.astype(bf16), br[2], br[3], nt2, mo2) + identity
            a = jnp.maximum(out2, 0.0).astype(bf16)

        # global avgpool + flatten + fc (avg-over-width folded into head_ref)
        g = jnp.dot(sl_ref[...], a, preferred_element_type=f32)       # [Rfeat, W*C]
        logits = jnp.dot(g.astype(bf16), head_ref[...], preferred_element_type=f32) + bias_ref[...]
        out_ref[...] = logits                                         # [Rfeat, 128] lane-dense

    return kernel


# --------------------------------------------------------------------------
# Builder: PyTorch-layout params -> kernel operands + a forward fn.
# --------------------------------------------------------------------------
def build_forward(params, batch, H0=16, W0=16, C0=3, b_tile=8):
    B = min(b_tile, batch)                # images per grid step (sublane-stacked)
    batch_pad = _ceil_to(batch, B)
    n_tiles = batch_pad // B

    consts, specs = [], []

    def add(arr, dtype=jnp.bfloat16):
        a = jnp.asarray(np.asarray(arr, np.float32), dtype=dtype)
        consts.append(a)
        specs.append(pl.BlockSpec(a.shape, lambda n, _nd=a.ndim: (0,) * _nd))

    meta = {"blocks": []}
    H, W, C = H0, W0, C0

    w1 = np.asarray(params["conv1"], np.float32)
    Lc, Kc, nt, mo, H, W = _conv_ops(w1, H, W, B, stride=2, pad=3)
    C = w1.shape[0]
    add(Lc); add(Kc)
    meta["conv1"] = (nt, mo)

    Rcat, Lcat, ncol, nrow, woc, rout, H, W = _maxpool_ops(H, W, C, B)
    add(Rcat); add(Lcat)
    meta["pool"] = (ncol, nrow, woc, rout)

    for blk in params["blocks"]:
        s = int(blk["stride"])
        L1, K1, nt1, mo1, H1, W1 = _conv_ops(np.asarray(blk["conv1_w"], np.float32), H, W, B, s, 1)
        L2, K2, nt2, mo2, H2, W2 = _conv_ops(np.asarray(blk["conv2_w"], np.float32), H1, W1, B, 1, 1)
        add(L1); add(K1); add(L2); add(K2)
        bm = {"c1": (nt1, mo1), "c2": (nt2, mo2)}
        if "down_w" in blk:
            Ld, Kd, ntd, mod, _, _ = _conv_ops(np.asarray(blk["down_w"], np.float32), H, W, B, s, 0)
            add(Ld); add(Kd)
            bm["down"] = (ntd, mod)
        else:
            bm["down"] = None
        meta["blocks"].append(bm)
        H, W, C = H2, W2, int(np.asarray(blk["conv1_w"]).shape[0])

    SL, headR, bias, Rfeat = _head_ops(H, W, C, B, params["fc_w"], params["fc_b"])
    add(SL); add(headR); add(bias, dtype=jnp.float32)

    kernel = _make_kernel(meta)

    Rin0 = max(8, _ceil_to(B * H0, 8))
    x_spec = pl.BlockSpec((Rin0, W0 * C0), lambda n: (n, 0))       # one contiguous slab / step
    out_spec = pl.BlockSpec((Rfeat, LANE), lambda n: (n, 0))       # lane-dense (128-wide) store

    call = pl.pallas_call(
        kernel,
        out_shape=jax.ShapeDtypeStruct((n_tiles * Rfeat, LANE), jnp.float32),
        grid_spec=pltpu.PrefetchScalarGridSpec(
            num_scalar_prefetch=0,
            grid=(n_tiles,),
            in_specs=[x_spec] + specs,
            out_specs=out_spec,
        ),
        compiler_params=pltpu.CompilerParams(
            dimension_semantics=("parallel",),   # batch tiles across TCs on v7x megacore
        ),
    )

    def forward(x_nchw):
        nb = x_nchw.shape[0]
        x = jnp.transpose(x_nchw, (0, 2, 3, 1)).reshape(nb, H0, W0 * C0)   # NCHW -> [b, h, w*c]
        if batch_pad > nb:
            x = jnp.concatenate(
                [x, jnp.zeros((batch_pad - nb, H0, W0 * C0), x.dtype)], axis=0)
        x = x.reshape(n_tiles, B * H0, W0 * C0)
        if Rin0 > B * H0:
            x = jnp.concatenate(
                [x, jnp.zeros((n_tiles, Rin0 - B * H0, W0 * C0), x.dtype)], axis=1)
        x = x.reshape(n_tiles * Rin0, W0 * C0).astype(jnp.bfloat16)
        out = call(x, *consts)                                     # [n_tiles*Rfeat, 128]
        out = out.reshape(n_tiles, Rfeat, LANE)[:, :B, :NUM_CLASSES]
        return out.reshape(batch_pad, NUM_CLASSES)[:batch]

    return forward


# --------------------------------------------------------------------------
# Pure-JAX f32 reference (loose numerical sanity check; kernel runs bf16).
# --------------------------------------------------------------------------
def reference_forward(x, params):
    def conv(y, w, stride, pad):
        return jax.lax.conv_general_dilated(
            y, w, window_strides=(stride, stride),
            padding=((pad, pad), (pad, pad)),
            dimension_numbers=("NCHW", "OIHW", "NCHW"))

    y = jax.nn.relu(conv(x, params["conv1"], 2, 3))
    y = jax.lax.reduce_window(
        y, -jnp.inf, jax.lax.max,
        window_dimensions=(1, 1, 3, 3), window_strides=(1, 1, 2, 2),
        padding=((0, 0), (0, 0), (1, 1), (1, 1)))
    for blk in params["blocks"]:
        s = int(blk["stride"])
        out = jax.nn.relu(conv(y, blk["conv1_w"], s, 1))
        identity = conv(y, blk["down_w"], s, 0) if "down_w" in blk else y
        y = jax.nn.relu(conv(out, blk["conv2_w"], 1, 1) + identity)
    feat = jnp.mean(y, axis=(2, 3))
    return feat @ params["fc_w"].T + params["fc_b"]


if __name__ == "__main__":
    key = jax.random.PRNGKey(0)
    pkey, xkey = jax.random.split(key)
    params = init_params(pkey)

    batch = 16
    x = jax.random.normal(xkey, (batch, 3, 16, 16), jnp.float32)  # NCHW, PyTorch-style

    fwd = jax.jit(build_forward(params, batch=batch, H0=16, W0=16, C0=3, b_tile=8))
    out = jax.block_until_ready(fwd(x))

    assert out.shape == (batch, NUM_CLASSES), out.shape
    assert out.dtype == jnp.float32
    assert bool(jnp.all(jnp.isfinite(out)))

    # Loose correctness check vs. f32 reference (kernel runs bf16 matmuls).
    ref = reference_forward(x, params)
    err = float(jnp.max(jnp.abs(out - ref)))
    scale = float(jnp.max(jnp.abs(ref))) + 1e-6
    assert err <= 0.1 * scale + 0.1, (err, scale)

    print("KERNEL_OK")
</pallas_src>

<mosaic_0001>
module attributes {stable_mosaic.version = 11 : i64} {
  func.func @kernel(%arg0: i32, %arg1: memref<128x48xbf16, #tpu.memory_space<vmem>>, %arg2: memref<448x128xbf16, #tpu.memory_space<vmem>>, %arg3: memref<336x64xbf16, #tpu.memory_space<vmem>>, %arg4: memref<64x96xbf16, #tpu.memory_space<vmem>>, %arg5: memref<96x64xbf16, #tpu.memory_space<vmem>>, %arg6: memref<96x32xbf16, #tpu.memory_space<vmem>>, %arg7: memref<96x32xbf16, #tpu.memory_space<vmem>>, %arg8: memref<96x32xbf16, #tpu.memory_space<vmem>>, %arg9: memref<96x32xbf16, #tpu.memory_space<vmem>>, %arg10: memref<48x32xbf16, #tpu.memory_space<vmem>>, %arg11: memref<96x32xbf16, #tpu.memory_space<vmem>>, %arg12: memref<48x16xbf16, #tpu.memory_space<vmem>>, %arg13: memref<96x32xbf16, #tpu.memory_space<vmem>>, %arg14: memref<16x32xbf16, #tpu.memory_space<vmem>>, %arg15: memref<32x32xbf16, #tpu.memory_space<vmem>>, %arg16: memref<16x16xbf16, #tpu.memory_space<vmem>>, %arg17: memref<64x32xbf16, #tpu.memory_space<vmem>>, %arg18: memref<8x8xbf16, #tpu.memory_space<vmem>>, %arg19: memref<32x32xbf16, #tpu.memory_space<vmem>>, %arg20: memref<8x16xbf16, #tpu.memory_space<vmem>>, %arg21: memref<32x32xbf16, #tpu.memory_space<vmem>>, %arg22: memref<8x8xbf16, #tpu.memory_space<vmem>>, %arg23: memref<32x64xbf16, #tpu.memory_space<vmem>>, %arg24: memref<8x8xbf16, #tpu.memory_space<vmem>>, %arg25: memref<64x64xbf16, #tpu.memory_space<vmem>>, %arg26: memref<8x8xbf16, #tpu.memory_space<vmem>>, %arg27: memref<32x64xbf16, #tpu.memory_space<vmem>>, %arg28: memref<8x8xbf16, #tpu.memory_space<vmem>>, %arg29: memref<64x128xbf16, #tpu.memory_space<vmem>>, %arg30: memref<1x128xf32, #tpu.memory_space<vmem>>, %arg31: memref<8x128xf32, #tpu.memory_space<vmem>>) attributes {dimension_semantics = [#tpu.dimension_semantics<parallel>], iteration_bounds = array<i64: 2>, scalar_prefetch = 0 : i64, scratch_operands = 0 : i64, tpu.core_type = #tpu.core_type<tc>, window_params = [{transform_indices = @transform_0, window_bounds = array<i64: 128, 48>}, {pipeline_mode = #tpu.pipeline_mode<synchronous>, transform_indices = @transform_1, window_bounds = array<i64: 448, 128>}, {pipeline_mode = #tpu.pipeline_mode<synchronous>, transform_indices = @transform_2, window_bounds = array<i64: 336, 64>}, {pipeline_mode = #tpu.pipeline_mode<synchronous>, transform_indices = @transform_3, window_bounds = array<i64: 64, 96>}, {pipeline_mode = #tpu.pipeline_mode<synchronous>, transform_indices = @transform_4, window_bounds = array<i64: 96, 64>}, {pipeline_mode = #tpu.pipeline_mode<synchronous>, transform_indices = @transform_5, window_bounds = array<i64: 96, 32>}, {pipeline_mode = #tpu.pipeline_mode<synchronous>, transform_indices = @transform_6, window_bounds = array<i64: 96, 32>}, {pipeline_mode = #tpu.pipeline_mode<synchronous>, transform_indices = @transform_7, window_bounds = array<i64: 96, 32>}, {pipeline_mode = #tpu.pipeline_mode<synchronous>, transform_indices = @transform_8, window_bounds = array<i64: 96, 32>}, {pipeline_mode = #tpu.pipeline_mode<synchronous>, transform_indices = @transform_9, window_bounds = array<i64: 48, 32>}, {pipeline_mode = #tpu.pipeline_mode<synchronous>, transform_indices = @transform_10, window_bounds = array<i64: 96, 32>}, {pipeline_mode = #tpu.pipeline_mode<synchronous>, transform_indices = @transform_11, window_bounds = array<i64: 48, 16>}, {pipeline_mode = #tpu.pipeline_mode<synchronous>, transform_indices = @transform_12, window_bounds = array<i64: 96, 32>}, {pipeline_mode = #tpu.pipeline_mode<synchronous>, transform_indices = @transform_13, window_bounds = array<i64: 16, 32>}, {pipeline_mode = #tpu.pipeline_mode<synchronous>, transform_indices = @transform_14, window_bounds = array<i64: 32, 32>}, {pipeline_mode = #tpu.pipeline_mode<synchronous>, transform_indices = @transform_15, window_bounds = array<i64: 16, 16>}, {pipeline_mode = #tpu.pipeline_mode<synchronous>, transform_indices = @transform_16, window_bounds = array<i64: 64, 32>}, {pipeline_mode = #tpu.pipeline_mode<synchronous>, transform_indices = @transform_17, window_bounds = array<i64: 8, 8>}, {pipeline_mode = #tpu.pipeline_mode<synchronous>, transform_indices = @transform_18, window_bounds = array<i64: 32, 32>}, {pipeline_mode = #tpu.pipeline_mode<synchronous>, transform_indices = @transform_19, window_bounds = array<i64: 8, 16>}, {pipeline_mode = #tpu.pipeline_mode<synchronous>, transform_indices = @transform_20, window_bounds = array<i64: 32, 32>}, {pipeline_mode = #tpu.pipeline_mode<synchronous>, transform_indices = @transform_21, window_bounds = array<i64: 8, 8>}, {pipeline_mode = #tpu.pipeline_mode<synchronous>, transform_indices = @transform_22, window_bounds = array<i64: 32, 64>}, {pipeline_mode = #tpu.pipeline_mode<synchronous>, transform_indices = @transform_23, window_bounds = array<i64: 8, 8>}, {pipeline_mode = #tpu.pipeline_mode<synchronous>, transform_indices = @transform_24, window_bounds = array<i64: 64, 64>}, {pipeline_mode = #tpu.pipeline_mode<synchronous>, transform_indices = @transform_25, window_bounds = array<i64: 8, 8>}, {pipeline_mode = #tpu.pipeline_mode<synchronous>, transform_indices = @transform_26, window_bounds = array<i64: 32, 64>}, {pipeline_mode = #tpu.pipeline_mode<synchronous>, transform_indices = @transform_27, window_bounds = array<i64: 8, 8>}, {pipeline_mode = #tpu.pipeline_mode<synchronous>, transform_indices = @transform_28, window_bounds = array<i64: 64, 128>}, {pipeline_mode = #tpu.pipeline_mode<synchronous>, transform_indices = @transform_29, window_bounds = array<i64: 1, 128>}, {transform_indices = @transform_30, window_bounds = array<i64: 8, 128>}]} {
    %c0 = arith.constant 0 : index
    %c0_0 = arith.constant 0 : index
    %0 = vector.load %arg1[%c0, %c0_0] : memref<128x48xbf16, #tpu.memory_space<vmem>>, vector<128x48xbf16>
    %c0_1 = arith.constant 0 : index
    %c0_2 = arith.constant 0 : index
    %1 = vector.load %arg2[%c0_1, %c0_2] : memref<448x128xbf16, #tpu.memory_space<vmem>>, vector<448x128xbf16>
    %cst = arith.constant dense<0.000000e+00> : vector<448x48xf32>
    %2 = tpu.matmul %1, %0, %cst {dimension_numbers = #tpu.dot_dimension_numbers<[1], [0], [0], [1], [0, 0, 1, 1], [], []>} : vector<448x128xbf16>, vector<128x48xbf16>, vector<448x48xf32> -> vector<448x48xf32>
    %3 = vector.extract_strided_slice %2 {offsets = [0, 0], sizes = [64, 48], strides = [1, 1]} : vector<448x48xf32> to vector<64x48xf32>
    %4 = vector.extract_strided_slice %2 {offsets = [64, 0], sizes = [64, 48], strides = [1, 1]} : vector<448x48xf32> to vector<64x48xf32>
    %5 = vector.extract_strided_slice %2 {offsets = [128, 0], sizes = [64, 48], strides = [1, 1]} : vector<448x48xf32> to vector<64x48xf32>
    %6 = vector.extract_strided_slice %2 {offsets = [192, 0], sizes = [64, 48], strides = [1, 1]} : vector<448x48xf32> to vector<64x48xf32>
    %7 = vector.extract_strided_slice %2 {offsets = [256, 0], sizes = [64, 48], strides = [1, 1]} : vector<448x48xf32> to vector<64x48xf32>
    %8 = vector.extract_strided_slice %2 {offsets = [320, 0], sizes = [64, 48], strides = [1, 1]} : vector<448x48xf32> to vector<64x48xf32>
    %9 = vector.extract_strided_slice %2 {offsets = [384, 0], sizes = [64, 48], strides = [1, 1]} : vector<448x48xf32> to vector<64x48xf32>
    %10 = tpu.concatenate %3, %4, %5, %6, %7, %8, %9 in 1 : vector<64x48xf32>, vector<64x48xf32>, vector<64x48xf32>, vector<64x48xf32>, vector<64x48xf32>, vector<64x48xf32>, vector<64x48xf32> -> vector<64x336xf32>
    %11 = arith.truncf %10 : vector<64x336xf32> to vector<64x336xbf16>
    %c0_3 = arith.constant 0 : index
    %c0_4 = arith.constant 0 : index
    %12 = vector.load %arg3[%c0_3, %c0_4] : memref<336x64xbf16, #tpu.memory_space<vmem>>, vector<336x64xbf16>
    %cst_5 = arith.constant dense<0.000000e+00> : vector<64x64xf32>
    %13 = tpu.matmul %11, %12, %cst_5 {dimension_numbers = #tpu.dot_dimension_numbers<[1], [0], [0], [1], [0, 0, 1, 1], [], []>} : vector<64x336xbf16>, vector<336x64xbf16>, vector<64x64xf32> -> vector<64x64xf32>
    %cst_6 = arith.constant 0.000000e+00 : f32
    %14 = vector.broadcast %cst_6 : f32 to vector<64x64xf32>
    %15 = arith.maximumf %13, %14 : vector<64x64xf32>
    %16 = arith.truncf %15 : vector<64x64xf32> to vector<64x64xbf16>
    %c0_7 = arith.constant 0 : index
    %c0_8 = arith.constant 0 : index
    %17 = vector.load %arg4[%c0_7, %c0_8] : memref<64x96xbf16, #tpu.memory_space<vmem>>, vector<64x96xbf16>
    %cst_9 = arith.constant dense<0.000000e+00> : vector<64x96xf32>
    %18 = tpu.matmul %16, %17, %cst_9 {dimension_numbers = #tpu.dot_dimension_numbers<[1], [0], [0], [1], [0, 0, 1, 1], [], []>} : vector<64x64xbf16>, vector<64x96xbf16>, vector<64x96xf32> -> vector<64x96xf32>
    %19 = vector.extract_strided_slice %18 {offsets = [0, 0], sizes = [64, 32], strides = [1, 1]} : vector<64x96xf32> to vector<64x32xf32>
    %20 = vector.extract_strided_slice %18 {offsets = [0, 32], sizes = [64, 32], strides = [1, 1]} : vector<64x96xf32> to vector<64x32xf32>
    %21 = arith.maximumf %19, %20 : vector<64x32xf32>
    %22 = vector.extract_strided_slice %18 {offsets = [0, 64], sizes = [64, 32], strides = [1, 1]} : vector<64x96xf32> to vector<64x32xf32>
    %23 = arith.maximumf %21, %22 : vector<64x32xf32>
    %c0_10 = arith.constant 0 : index
    %c0_11 = arith.constant 0 : index
    %24 = vector.load %arg5[%c0_10, %c0_11] : memref<96x64xbf16, #tpu.memory_space<vmem>>, vector<96x64xbf16>
    %25 = arith.truncf %23 : vector<64x32xf32> to vector<64x32xbf16>
    %cst_12 = arith.constant dense<0.000000e+00> : vector<96x32xf32>
    %26 = tpu.matmul %24, %25, %cst_12 {dimension_numbers = #tpu.dot_dimension_numbers<[1], [0], [0], [1], [0, 0, 1, 1], [], []>} : vector<96x64xbf16>, vector<64x32xbf16>, vector<96x32xf32> -> vector<96x32xf32>
    %27 = vector.extract_strided_slice %26 {offsets = [0, 0], sizes = [32, 32], strides = [1, 1]} : vector<96x32xf32> to vector<32x32xf32>
    %28 = vector.extract_strided_slice %26 {offsets = [32, 0], sizes = [32, 32], strides = [1, 1]} : vector<96x32xf32> to vector<32x32xf32>
    %29 = arith.maximumf %27, %28 : vector<32x32xf32>
    %30 = vector.extract_strided_slice %26 {offsets = [64, 0], sizes = [32, 32], strides = [1, 1]} : vector<96x32xf32> to vector<32x32xf32>
    %31 = arith.maximumf %29, %30 : vector<32x32xf32>
    %32 = arith.truncf %31 : vector<32x32xf32> to vector<32x32xbf16>
    %c0_13 = arith.constant 0 : index
    %c0_14 = arith.constant 0 : index
    %33 = vector.load %arg6[%c0_13, %c0_14] : memref<96x32xbf16, #tpu.memory_space<vmem>>, vector<96x32xbf16>
    %cst_15 = arith.constant dense<0.000000e+00> : vector<96x32xf32>
    %34 = tpu.matmul %33, %32, %cst_15 {dimension_numbers = #tpu.dot_dimension_numbers<[1], [0], [0], [1], [0, 0, 1, 1], [], []>} : vector<96x32xbf16>, vector<32x32xbf16>, vector<96x32xf32> -> vector<96x32xf32>
    %35 = vector.extract_strided_slice %34 {offsets = [0, 0], sizes = [32, 32], strides = [1, 1]} : vector<96x32xf32> to vector<32x32xf32>
    %36 = vector.extract_strided_slice %34 {offsets = [32, 0], sizes = [32, 32], strides = [1, 1]} : vector<96x32xf32> to vector<32x32xf32>
    %37 = vector.extract_strided_slice %34 {offsets = [64, 0], sizes = [32, 32], strides = [1, 1]} : vector<96x32xf32> to vector<32x32xf32>
    %38 = tpu.concatenate %35, %36, %37 in 1 : vector<32x32xf32>, vector<32x32xf32>, vector<32x32xf32> -> vector<32x96xf32>
    %39 = arith.truncf %38 : vector<32x96xf32> to vector<32x96xbf16>
    %c0_16 = arith.constant 0 : index
    %c0_17 = arith.constant 0 : index
    %40 = vector.load %arg7[%c0_16, %c0_17] : memref<96x32xbf16, #tpu.memory_space<vmem>>, vector<96x32xbf16>
    %cst_18 = arith.constant dense<0.000000e+00> : vector<32x32xf32>
    %41 = tpu.matmul %39, %40, %cst_18 {dimension_numbers = #tpu.dot_dimension_numbers<[1], [0], [0], [1], [0, 0, 1, 1], [], []>} : vector<32x96xbf16>, vector<96x32xbf16>, vector<32x32xf32> -> vector<32x32xf32>
    %cst_19 = arith.constant 0.000000e+00 : f32
    %42 = vector.broadcast %cst_19 : f32 to vector<32x32xf32>
    %43 = arith.maximumf %41, %42 : vector<32x32xf32>
    %44 = arith.extf %32 : vector<32x32xbf16> to vector<32x32xf32>
    %45 = arith.truncf %43 : vector<32x32xf32> to vector<32x32xbf16>
    %c0_20 = arith.constant 0 : index
    %c0_21 = arith.constant 0 : index
    %46 = vector.load %arg8[%c0_20, %c0_21] : memref<96x32xbf16, #tpu.memory_space<vmem>>, vector<96x32xbf16>
    %cst_22 = arith.constant dense<0.000000e+00> : vector<96x32xf32>
    %47 = tpu.matmul %46, %45, %cst_22 {dimension_numbers = #tpu.dot_dimension_numbers<[1], [0], [0], [1], [0, 0, 1, 1], [], []>} : vector<96x32xbf16>, vector<32x32xbf16>, vector<96x32xf32> -> vector<96x32xf32>
    %48 = vector.extract_strided_slice %47 {offsets = [0, 0], sizes = [32, 32], strides = [1, 1]} : vector<96x32xf32> to vector<32x32xf32>
    %49 = vector.extract_strided_slice %47 {offsets = [32, 0], sizes = [32, 32], strides = [1, 1]} : vector<96x32xf32> to vector<32x32xf32>
    %50 = vector.extract_strided_slice %47 {offsets = [64, 0], sizes = [32, 32], strides = [1, 1]} : vector<96x32xf32> to vector<32x32xf32>
    %51 = tpu.concatenate %48, %49, %50 in 1 : vector<32x32xf32>, vector<32x32xf32>, vector<32x32xf32> -> vector<32x96xf32>
    %52 = arith.truncf %51 : vector<32x96xf32> to vector<32x96xbf16>
    %c0_23 = arith.constant 0 : index
    %c0_24 = arith.constant 0 : index
    %53 = vector.load %arg9[%c0_23, %c0_24] : memref<96x32xbf16, #tpu.memory_space<vmem>>, vector<96x32xbf16>
    %cst_25 = arith.constant dense<0.000000e+00> : vector<32x32xf32>
    %54 = tpu.matmul %52, %53, %cst_25 {dimension_numbers = #tpu.dot_dimension_numbers<[1], [0], [0], [1], [0, 0, 1, 1], [], []>} : vector<32x96xbf16>, vector<96x32xbf16>, vector<32x32xf32> -> vector<32x32xf32>
    %55 = arith.addf %54, %44 : vector<32x32xf32>
    %cst_26 = arith.constant 0.000000e+00 : f32
    %56 = vector.broadcast %cst_26 : f32 to vector<32x32xf32>
    %57 = arith.maximumf %55, %56 : vector<32x32xf32>
    %58 = arith.truncf %57 : vector<32x32xf32> to vector<32x32xbf16>
    %c0_27 = arith.constant 0 : index
    %c0_28 = arith.constant 0 : index
    %59 = vector.load %arg10[%c0_27, %c0_28] : memref<48x32xbf16, #tpu.memory_space<vmem>>, vector<48x32xbf16>
    %cst_29 = arith.constant dense<0.000000e+00> : vector<48x32xf32>
    %60 = tpu.matmul %59, %58, %cst_29 {dimension_numbers = #tpu.dot_dimension_numbers<[1], [0], [0], [1], [0, 0, 1, 1], [], []>} : vector<48x32xbf16>, vector<32x32xbf16>, vector<48x32xf32> -> vector<48x32xf32>
    %61 = vector.extract_strided_slice %60 {offsets = [0, 0], sizes = [16, 32], strides = [1, 1]} : vector<48x32xf32> to vector<16x32xf32>
    %62 = vector.extract_strided_slice %60 {offsets = [16, 0], sizes = [16, 32], strides = [1, 1]} : vector<48x32xf32> to vector<16x32xf32>
    %63 = vector.extract_strided_slice %60 {offsets = [32, 0], sizes = [16, 32], strides = [1, 1]} : vector<48x32xf32> to vector<16x32xf32>
    %64 = tpu.concatenate %61, %62, %63 in 1 : vector<16x32xf32>, vector<16x32xf32>, vector<16x32xf32> -> vector<16x96xf32>
    %65 = arith.truncf %64 : vector<16x96xf32> to vector<16x96xbf16>
    %c0_30 = arith.constant 0 : index
    %c0_31 = arith.constant 0 : index
    %66 = vector.load %arg11[%c0_30, %c0_31] : memref<96x32xbf16, #tpu.memory_space<vmem>>, vector<96x32xbf16>
    %cst_32 = arith.constant dense<0.000000e+00> : vector<16x32xf32>
    %67 = tpu.matmul %65, %66, %cst_32 {dimension_numbers = #tpu.dot_dimension_numbers<[1], [0], [0], [1], [0, 0, 1, 1], [], []>} : vector<16x96xbf16>, vector<96x32xbf16>, vector<16x32xf32> -> vector<16x32xf32>
    %cst_33 = arith.constant 0.000000e+00 : f32
    %68 = vector.broadcast %cst_33 : f32 to vector<16x32xf32>
    %69 = arith.maximumf %67, %68 : vector<16x32xf32>
    %c0_34 = arith.constant 0 : index
    %c0_35 = arith.constant 0 : index
    %70 = vector.load %arg14[%c0_34, %c0_35] : memref<16x32xbf16, #tpu.memory_space<vmem>>, vector<16x32xbf16>
    %cst_36 = arith.constant dense<0.000000e+00> : vector<16x32xf32>
    %71 = tpu.matmul %70, %58, %cst_36 {dimension_numbers = #tpu.dot_dimension_numbers<[1], [0], [0], [1], [0, 0, 1, 1], [], []>} : vector<16x32xbf16>, vector<32x32xbf16>, vector<16x32xf32> -> vector<16x32xf32>
    %72 = arith.truncf %71 : vector<16x32xf32> to vector<16x32xbf16>
    %c0_37 = arith.constant 0 : index
    %c0_38 = arith.constant 0 : index
    %73 = vector.load %arg15[%c0_37, %c0_38] : memref<32x32xbf16, #tpu.memory_space<vmem>>, vector<32x32xbf16>
    %cst_39 = arith.constant dense<0.000000e+00> : vector<16x32xf32>
    %74 = tpu.matmul %72, %73, %cst_39 {dimension_numbers = #tpu.dot_dimension_numbers<[1], [0], [0], [1], [0, 0, 1, 1], [], []>} : vector<16x32xbf16>, vector<32x32xbf16>, vector<16x32xf32> -> vector<16x32xf32>
    %75 = arith.truncf %69 : vector<16x32xf32> to vector<16x32xbf16>
    %c0_40 = arith.constant 0 : index
    %c0_41 = arith.constant 0 : index
    %76 = vector.load %arg12[%c0_40, %c0_41] : memref<48x16xbf16, #tpu.memory_space<vmem>>, vector<48x16xbf16>
    %cst_42 = arith.constant dense<0.000000e+00> : vector<48x32xf32>
    %77 = tpu.matmul %76, %75, %cst_42 {dimension_numbers = #tpu.dot_dimension_numbers<[1], [0], [0], [1], [0, 0, 1, 1], [], []>} : vector<48x16xbf16>, vector<16x32xbf16>, vector<48x32xf32> -> vector<48x32xf32>
    %78 = vector.extract_strided_slice %77 {offsets = [0, 0], sizes = [16, 32], strides = [1, 1]} : vector<48x32xf32> to vector<16x32xf32>
    %79 = vector.extract_strided_slice %77 {offsets = [16, 0], sizes = [16, 32], strides = [1, 1]} : vector<48x32xf32> to vector<16x32xf32>
    %80 = vector.extract_strided_slice %77 {offsets = [32, 0], sizes = [16, 32], strides = [1, 1]} : vector<48x32xf32> to vector<16x32xf32>
    %81 = tpu.concatenate %78, %79, %80 in 1 : vector<16x32xf32>, vector<16x32xf32>, vector<16x32xf32> -> vector<16x96xf32>
    %82 = arith.truncf %81 : vector<16x96xf32> to vector<16x96xbf16>
    %c0_43 = arith.constant 0 : index
    %c0_44 = arith.constant 0 : index
    %83 = vector.load %arg13[%c0_43, %c0_44] : memref<96x32xbf16, #tpu.memory_space<vmem>>, vector<96x32xbf16>
    %cst_45 = arith.constant dense<0.000000e+00> : vector<16x32xf32>
    %84 = tpu.matmul %82, %83, %cst_45 {dimension_numbers = #tpu.dot_dimension_numbers<[1], [0], [0], [1], [0, 0, 1, 1], [], []>} : vector<16x96xbf16>, vector<96x32xbf16>, vector<16x32xf32> -> vector<16x32xf32>
    %85 = arith.addf %84, %74 : vector<16x32xf32>
    %cst_46 = arith.constant 0.000000e+00 : f32
    %86 = vector.broadcast %cst_46 : f32 to vector<16x32xf32>
    %87 = arith.maximumf %85, %86 : vector<16x32xf32>
    %88 = arith.truncf %87 : vector<16x32xf32> to vector<16x32xbf16>
    %c0_47 = arith.constant 0 : index
    %c0_48 = arith.constant 0 : index
    %89 = vector.load %arg16[%c0_47, %c0_48] : memref<16x16xbf16, #tpu.memory_space<vmem>>, vector<16x16xbf16>
    %cst_49 = arith.constant dense<0.000000e+00> : vector<16x32xf32>
    %90 = tpu.matmul %89, %88, %cst_49 {dimension_numbers = #tpu.dot_dimension_numbers<[1], [0], [0], [1], [0, 0, 1, 1], [], []>} : vector<16x16xbf16>, vector<16x32xbf16>, vector<16x32xf32> -> vector<16x32xf32>
    %91 = vector.extract_strided_slice %90 {offsets = [0, 0], sizes = [8, 32], strides = [1, 1]} : vector<16x32xf32> to vector<8x32xf32>
    %92 = vector.extract_strided_slice %90 {offsets = [8, 0], sizes = [8, 32], strides = [1, 1]} : vector<16x32xf32> to vector<8x32xf32>
    %93 = tpu.concatenate %91, %92 in 1 : vector<8x32xf32>, vector<8x32xf32> -> vector<8x64xf32>
    %94 = arith.truncf %93 : vector<8x64xf32> to vector<8x64xbf16>
    %c0_50 = arith.constant 0 : index
    %c0_51 = arith.constant 0 : index
    %95 = vector.load %arg17[%c0_50, %c0_51] : memref<64x32xbf16, #tpu.memory_space<vmem>>, vector<64x32xbf16>
    %cst_52 = arith.constant dense<0.000000e+00> : vector<8x32xf32>
    %96 = tpu.matmul %94, %95, %cst_52 {dimension_numbers = #tpu.dot_dimension_numbers<[1], [0], [0], [1], [0, 0, 1, 1], [], []>} : vector<8x64xbf16>, vector<64x32xbf16>, vector<8x32xf32> -> vector<8x32xf32>
    %cst_53 = arith.constant 0.000000e+00 : f32
    %97 = vector.broadcast %cst_53 : f32 to vector<8x32xf32>
    %98 = arith.maximumf %96, %97 : vector<8x32xf32>
    %c0_54 = arith.constant 0 : index
    %c0_55 = arith.constant 0 : index
    %99 = vector.load %arg20[%c0_54, %c0_55] : memref<8x16xbf16, #tpu.memory_space<vmem>>, vector<8x16xbf16>
    %cst_56 = arith.constant dense<0.000000e+00> : vector<8x32xf32>
    %100 = tpu.matmul %99, %88, %cst_56 {dimension_numbers = #tpu.dot_dimension_numbers<[1], [0], [0], [1], [0, 0, 1, 1], [], []>} : vector<8x16xbf16>, vector<16x32xbf16>, vector<8x32xf32> -> vector<8x32xf32>
    %101 = arith.truncf %100 : vector<8x32xf32> to vector<8x32xbf16>
    %c0_57 = arith.constant 0 : index
    %c0_58 = arith.constant 0 : index
    %102 = vector.load %arg21[%c0_57, %c0_58] : memref<32x32xbf16, #tpu.memory_space<vmem>>, vector<32x32xbf16>
    %cst_59 = arith.constant dense<0.000000e+00> : vector<8x32xf32>
    %103 = tpu.matmul %101, %102, %cst_59 {dimension_numbers = #tpu.dot_dimension_numbers<[1], [0], [0], [1], [0, 0, 1, 1], [], []>} : vector<8x32xbf16>, vector<32x32xbf16>, vector<8x32xf32> -> vector<8x32xf32>
    %104 = arith.truncf %98 : vector<8x32xf32> to vector<8x32xbf16>
    %c0_60 = arith.constant 0 : index
    %c0_61 = arith.constant 0 : index
    %105 = vector.load %arg18[%c0_60, %c0_61] : memref<8x8xbf16, #tpu.memory_space<vmem>>, vector<8x8xbf16>
    %cst_62 = arith.constant dense<0.000000e+00> : vector<8x32xf32>
    %106 = tpu.matmul %105, %104, %cst_62 {dimension_numbers = #tpu.dot_dimension_numbers<[1], [0], [0], [1], [0, 0, 1, 1], [], []>} : vector<8x8xbf16>, vector<8x32xbf16>, vector<8x32xf32> -> vector<8x32xf32>
    %107 = arith.truncf %106 : vector<8x32xf32> to vector<8x32xbf16>
    %c0_63 = arith.constant 0 : index
    %c0_64 = arith.constant 0 : index
    %108 = vector.load %arg19[%c0_63, %c0_64] : memref<32x32xbf16, #tpu.memory_space<vmem>>, vector<32x32xbf16>
    %cst_65 = arith.constant dense<0.000000e+00> : vector<8x32xf32>
    %109 = tpu.matmul %107, %108, %cst_65 {dimension_numbers = #tpu.dot_dimension_numbers<[1], [0], [0], [1], [0, 0, 1, 1], [], []>} : vector<8x32xbf16>, vector<32x32xbf16>, vector<8x32xf32> -> vector<8x32xf32>
    %110 = arith.addf %109, %103 : vector<8x32xf32>
    %cst_66 = arith.constant 0.000000e+00 : f32
    %111 = vector.broadcast %cst_66 : f32 to vector<8x32xf32>
    %112 = arith.maximumf %110, %111 : vector<8x32xf32>
    %113 = arith.truncf %112 : vector<8x32xf32> to vector<8x32xbf16>
    %c0_67 = arith.constant 0 : index
    %c0_68 = arith.constant 0 : index
    %114 = vector.load %arg22[%c0_67, %c0_68] : memref<8x8xbf16, #tpu.memory_space<vmem>>, vector<8x8xbf16>
    %cst_69 = arith.constant dense<0.000000e+00> : vector<8x32xf32>
    %115 = tpu.matmul %114, %113, %cst_69 {dimension_numbers = #tpu.dot_dimension_numbers<[1], [0], [0], [1], [0, 0, 1, 1], [], []>} : vector<8x8xbf16>, vector<8x32xbf16>, vector<8x32xf32> -> vector<8x32xf32>
    %116 = arith.truncf %115 : vector<8x32xf32> to vector<8x32xbf16>
    %c0_70 = arith.constant 0 : index
    %c0_71 = arith.constant 0 : index
    %117 = vector.load %arg23[%c0_70, %c0_71] : memref<32x64xbf16, #tpu.memory_space<vmem>>, vector<32x64xbf16>
    %cst_72 = arith.constant dense<0.000000e+00> : vector<8x64xf32>
    %118 = tpu.matmul %116, %117, %cst_72 {dimension_numbers = #tpu.dot_dimension_numbers<[1], [0], [0], [1], [0, 0, 1, 1], [], []>} : vector<8x32xbf16>, vector<32x64xbf16>, vector<8x64xf32> -> vector<8x64xf32>
    %cst_73 = arith.constant 0.000000e+00 : f32
    %119 = vector.broadcast %cst_73 : f32 to vector<8x64xf32>
    %120 = arith.maximumf %118, %119 : vector<8x64xf32>
    %c0_74 = arith.constant 0 : index
    %c0_75 = arith.constant 0 : index
    %121 = vector.load %arg26[%c0_74, %c0_75] : memref<8x8xbf16, #tpu.memory_space<vmem>>, vector<8x8xbf16>
    %cst_76 = arith.constant dense<0.000000e+00> : vector<8x32xf32>
    %122 = tpu.matmul %121, %113, %cst_76 {dimension_numbers = #tpu.dot_dimension_numbers<[1], [0], [0], [1], [0, 0, 1, 1], [], []>} : vector<8x8xbf16>, vector<8x32xbf16>, vector<8x32xf32> -> vector<8x32xf32>
    %123 = arith.truncf %122 : vector<8x32xf32> to vector<8x32xbf16>
    %c0_77 = arith.constant 0 : index
    %c0_78 = arith.constant 0 : index
    %124 = vector.load %arg27[%c0_77, %c0_78] : memref<32x64xbf16, #tpu.memory_space<vmem>>, vector<32x64xbf16>
    %cst_79 = arith.constant dense<0.000000e+00> : vector<8x64xf32>
    %125 = tpu.matmul %123, %124, %cst_79 {dimension_numbers = #tpu.dot_dimension_numbers<[1], [0], [0], [1], [0, 0, 1, 1], [], []>} : vector<8x32xbf16>, vector<32x64xbf16>, vector<8x64xf32> -> vector<8x64xf32>
    %126 = arith.truncf %120 : vector<8x64xf32> to vector<8x64xbf16>
    %c0_80 = arith.constant 0 : index
    %c0_81 = arith.constant 0 : index
    %127 = vector.load %arg24[%c0_80, %c0_81] : memref<8x8xbf16, #tpu.memory_space<vmem>>, vector<8x8xbf16>
    %cst_82 = arith.constant dense<0.000000e+00> : vector<8x64xf32>
    %128 = tpu.matmul %127, %126, %cst_82 {dimension_numbers = #tpu.dot_dimension_numbers<[1], [0], [0], [1], [0, 0, 1, 1], [], []>} : vector<8x8xbf16>, vector<8x64xbf16>, vector<8x64xf32> -> vector<8x64xf32>
    %129 = arith.truncf %128 : vector<8x64xf32> to vector<8x64xbf16>
    %c0_83 = arith.constant 0 : index
    %c0_84 = arith.constant 0 : index
    %130 = vector.load %arg25[%c0_83, %c0_84] : memref<64x64xbf16, #tpu.memory_space<vmem>>, vector<64x64xbf16>
    %cst_85 = arith.constant dense<0.000000e+00> : vector<8x64xf32>
    %131 = tpu.matmul %129, %130, %cst_85 {dimension_numbers = #tpu.dot_dimension_numbers<[1], [0], [0], [1], [0, 0, 1, 1], [], []>} : vector<8x64xbf16>, vector<64x64xbf16>, vector<8x64xf32> -> vector<8x64xf32>
    %132 = arith.addf %131, %125 : vector<8x64xf32>
    %cst_86 = arith.constant 0.000000e+00 : f32
    %133 = vector.broadcast %cst_86 : f32 to vector<8x64xf32>
    %134 = arith.maximumf %132, %133 : vector<8x64xf32>
    %135 = arith.truncf %134 : vector<8x64xf32> to vector<8x64xbf16>
    %c0_87 = arith.constant 0 : index
    %c0_88 = arith.constant 0 : index
    %136 = vector.load %arg28[%c0_87, %c0_88] : memref<8x8xbf16, #tpu.memory_space<vmem>>, vector<8x8xbf16>
    %cst_89 = arith.constant dense<0.000000e+00> : vector<8x64xf32>
    %137 = tpu.matmul %136, %135, %cst_89 {dimension_numbers = #tpu.dot_dimension_numbers<[1], [0], [0], [1], [0, 0, 1, 1], [], []>} : vector<8x8xbf16>, vector<8x64xbf16>, vector<8x64xf32> -> vector<8x64xf32>
    %138 = arith.truncf %137 : vector<8x64xf32> to vector<8x64xbf16>
    %c0_90 = arith.constant 0 : index
    %c0_91 = arith.constant 0 : index
    %139 = vector.load %arg29[%c0_90, %c0_91] : memref<64x128xbf16, #tpu.memory_space<vmem>>, vector<64x128xbf16>
    %cst_92 = arith.constant dense<0.000000e+00> : vector<8x128xf32>
    %140 = tpu.matmul %138, %139, %cst_92 {dimension_numbers = #tpu.dot_dimension_numbers<[1], [0], [0], [1], [0, 0, 1, 1], [], []>} : vector<8x64xbf16>, vector<64x128xbf16>, vector<8x128xf32> -> vector<8x128xf32>
    %c0_93 = arith.constant 0 : index
    %c0_94 = arith.constant 0 : index
    %141 = vector.load %arg30[%c0_93, %c0_94] : memref<1x128xf32, #tpu.memory_space<vmem>>, vector<1x128xf32>
    %142 = vector.broadcast %141 : vector<1x128xf32> to vector<8x128xf32>
    %143 = arith.addf %140, %142 : vector<8x128xf32>
    %c0_95 = arith.constant 0 : index
    %c0_96 = arith.constant 0 : index
    %144 = vector.load %arg31[%c0_95, %c0_96] : memref<8x128xf32, #tpu.memory_space<vmem>>, vector<8x128xf32>
    tpu.vector_store %arg31[%c0_95, %c0_96], %143 {strides = array<i32>} : memref<8x128xf32, #tpu.memory_space<vmem>>, vector<8x128xf32>,
    return
  }
  func.func @transform_0(%arg0: i32) -> (i32, i32) {
    %c0_i32 = arith.constant 0 : i32
    %c0_i32_0 = arith.constant 0 : i32
    return %arg0, %c0_i32 : i32, i32
  }
  func.func @transform_1(%arg0: i32) -> (i32, i32) {
    %c0_i32 = arith.constant 0 : i32
    %c0_i32_0 = arith.constant 0 : i32
    %c0_i32_1 = arith.constant 0 : i32
    return %c0_i32, %c0_i32_0 : i32, i32
  }
  func.func @transform_2(%arg0: i32) -> (i32, i32) {
    %c0_i32 = arith.constant 0 : i32
    %c0_i32_0 = arith.constant 0 : i32
    %c0_i32_1 = arith.constant 0 : i32
    return %c0_i32, %c0_i32_0 : i32, i32
  }
  func.func @transform_3(%arg0: i32) -> (i32, i32) {
    %c0_i32 = arith.constant 0 : i32
    %c0_i32_0 = arith.constant 0 : i32
    %c0_i32_1 = arith.constant 0 : i32
    return %c0_i32, %c0_i32_0 : i32, i32
  }
  func.func @transform_4(%arg0: i32) -> (i32, i32) {
    %c0_i32 = arith.constant 0 : i32
    %c0_i32_0 = arith.constant 0 : i32
    %c0_i32_1 = arith.constant 0 : i32
    return %c0_i32, %c0_i32_0 : i32, i32
  }
  func.func @transform_5(%arg0: i32) -> (i32, i32) {
    %c0_i32 = arith.constant 0 : i32
    %c0_i32_0 = arith.constant 0 : i32
    %c0_i32_1 = arith.constant 0 : i32
    return %c0_i32, %c0_i32_0 : i32, i32
  }
  func.func @transform_6(%arg0: i32) -> (i32, i32) {
    %c0_i32 = arith.constant 0 : i32
    %c0_i32_0 = arith.constant 0 : i32
    %c0_i32_1 = arith.constant 0 : i32
    return %c0_i32, %c0_i32_0 : i32, i32
  }
  func.func @transform_7(%arg0: i32) -> (i32, i32) {
    %c0_i32 = arith.constant 0 : i32
    %c0_i32_0 = arith.constant 0 : i32
    %c0_i32_1 = arith.constant 0 : i32
    return %c0_i32, %c0_i32_0 : i32, i32
  }
  func.func @transform_8(%arg0: i32) -> (i32, i32) {
    %c0_i32 = arith.constant 0 : i32
    %c0_i32_0 = arith.constant 0 : i32
    %c0_i32_1 = arith.constant 0 : i32
    return %c0_i32, %c0_i32_0 : i32, i32
  }
  func.func @transform_9(%arg0: i32) -> (i32, i32) {
    %c0_i32 = arith.constant 0 : i32
    %c0_i32_0 = arith.constant 0 : i32
    %c0_i32_1 = arith.constant 0 : i32
    return %c0_i32, %c0_i32_0 : i32, i32
  }
  func.func @transform_10(%arg0: i32) -> (i32, i32) {
    %c0_i32 = arith.constant 0 : i32
    %c0_i32_0 = arith.constant 0 : i32
    %c0_i32_1 = arith.constant 0 : i32
    return %c0_i32, %c0_i32_0 : i32, i32
  }
  func.func @transform_11(%arg0: i32) -> (i32, i32) {
    %c0_i32 = arith.constant 0 : i32
    %c0_i32_0 = arith.constant 0 : i32
    %c0_i32_1 = arith.constant 0 : i32
    return %c0_i32, %c0_i32_0 : i32, i32
  }
  func.func @transform_12(%arg0: i32) -> (i32, i32) {
    %c0_i32 = arith.constant 0 : i32
    %c0_i32_0 = arith.constant 0 : i32
    %c0_i32_1 = arith.constant 0 : i32
    return %c0_i32, %c0_i32_0 : i32, i32
  }
  func.func @transform_13(%arg0: i32) -> (i32, i32) {
    %c0_i32 = arith.constant 0 : i32
    %c0_i32_0 = arith.constant 0 : i32
    %c0_i32_1 = arith.constant 0 : i32
    return %c0_i32, %c0_i32_0 : i32, i32
  }
  func.func @transform_14(%arg0: i32) -> (i32, i32) {
    %c0_i32 = arith.constant 0 : i32
    %c0_i32_0 = arith.constant 0 : i32
    %c0_i32_1 = arith.constant 0 : i32
    return %c0_i32, %c0_i32_0 : i32, i32
  }
  func.func @transform_15(%arg0: i32) -> (i32, i32) {
    %c0_i32 = arith.constant 0 : i32
    %c0_i32_0 = arith.constant 0 : i32
    %c0_i32_1 = arith.constant 0 : i32
    return %c0_i32, %c0_i32_0 : i32, i32
  }
  func.func @transform_16(%arg0: i32) -> (i32, i32) {
    %c0_i32 = arith.constant 0 : i32
    %c0_i32_0 = arith.constant 0 : i32
    %c0_i32_1 = arith.constant 0 : i32
    return %c0_i32, %c0_i32_0 : i32, i32
  }
  func.func @transform_17(%arg0: i32) -> (i32, i32) {
    %c0_i32 = arith.constant 0 : i32
    %c0_i32_0 = arith.constant 0 : i32
    %c0_i32_1 = arith.constant 0 : i32
    return %c0_i32, %c0_i32_0 : i32, i32
  }
  func.func @transform_18(%arg0: i32) -> (i32, i32) {
    %c0_i32 = arith.constant 0 : i32
    %c0_i32_0 = arith.constant 0 : i32
    %c0_i32_1 = arith.constant 0 : i32
    return %c0_i32, %c0_i32_0 : i32, i32
  }
  func.func @transform_19(%arg0: i32) -> (i32, i32) {
    %c0_i32 = arith.constant 0 : i32
    %c0_i32_0 = arith.constant 0 : i32
    %c0_i32_1 = arith.constant 0 : i32
    return %c0_i32, %c0_i32_0 : i32, i32
  }
  func.func @transform_20(%arg0: i32) -> (i32, i32) {
    %c0_i32 = arith.constant 0 : i32
    %c0_i32_0 = arith.constant 0 : i32
    %c0_i32_1 = arith.constant 0 : i32
    return %c0_i32, %c0_i32_0 : i32, i32
  }
  func.func @transform_21(%arg0: i32) -> (i32, i32) {
    %c0_i32 = arith.constant 0 : i32
    %c0_i32_0 = arith.constant 0 : i32
    %c0_i32_1 = arith.constant 0 : i32
    return %c0_i32, %c0_i32_0 : i32, i32
  }
  func.func @transform_22(%arg0: i32) -> (i32, i32) {
    %c0_i32 = arith.constant 0 : i32
    %c0_i32_0 = arith.constant 0 : i32
    %c0_i32_1 = arith.constant 0 : i32
    return %c0_i32, %c0_i32_0 : i32, i32
  }
  func.func @transform_23(%arg0: i32) -> (i32, i32) {
    %c0_i32 = arith.constant 0 : i32
    %c0_i32_0 = arith.constant 0 : i32
    %c0_i32_1 = arith.constant 0 : i32
    return %c0_i32, %c0_i32_0 : i32, i32
  }
  func.func @transform_24(%arg0: i32) -> (i32, i32) {
    %c0_i32 = arith.constant 0 : i32
    %c0_i32_0 = arith.constant 0 : i32
    %c0_i32_1 = arith.constant 0 : i32
    return %c0_i32, %c0_i32_0 : i32, i32
  }
  func.func @transform_25(%arg0: i32) -> (i32, i32) {
    %c0_i32 = arith.constant 0 : i32
    %c0_i32_0 = arith.constant 0 : i32
    %c0_i32_1 = arith.constant 0 : i32
    return %c0_i32, %c0_i32_0 : i32, i32
  }
  func.func @transform_26(%arg0: i32) -> (i32, i32) {
    %c0_i32 = arith.constant 0 : i32
    %c0_i32_0 = arith.constant 0 : i32
    %c0_i32_1 = arith.constant 0 : i32
    return %c0_i32, %c0_i32_0 : i32, i32
  }
  func.func @transform_27(%arg0: i32) -> (i32, i32) {
    %c0_i32 = arith.constant 0 : i32
    %c0_i32_0 = arith.constant 0 : i32
    %c0_i32_1 = arith.constant 0 : i32
    return %c0_i32, %c0_i32_0 : i32, i32
  }
  func.func @transform_28(%arg0: i32) -> (i32, i32) {
    %c0_i32 = arith.constant 0 : i32
    %c0_i32_0 = arith.constant 0 : i32
    %c0_i32_1 = arith.constant 0 : i32
    return %c0_i32, %c0_i32_0 : i32, i32
  }
  func.func @transform_29(%arg0: i32) -> (i32, i32) {
    %c0_i32 = arith.constant 0 : i32
    %c0_i32_0 = arith.constant 0 : i32
    %c0_i32_1 = arith.constant 0 : i32
    return %c0_i32, %c0_i32_0 : i32, i32
  }
  func.func @transform_30(%arg0: i32) -> (i32, i32) {
    %c0_i32 = arith.constant 0 : i32
    %c0_i32_0 = arith.constant 0 : i32
    return %arg0, %c0_i32 : i32, i32
  }
}

</mosaic_0001>

<bundles_post_ra>
// kernel: forward.1
= control target key start
LH: loop header
LB: loop body
LE: loop exit
PB: predicated region body
PF: predicated region fallthrough
CT: control target
= control target key end

     0   :  { %s5589_s6 = smov 1   ;;  %s5590_s10 = smov 2   ;;  %s6337_s0 = inlined_call_operand.smem [shape: u32[31], index: -1, kind: input, shape index: {}] }
   0x1   :  { %s5635_s5 = sld [smem:[%s6337_s0]]   ;;  %s5591_s14 = smov 3  }
   0x2   :  { %s5640_s9 = sld [smem:[%s6337_s0 + %s5589_s6]]   ;;  %s5592_s18 = smov 4  }
   0x3   :  { %s5645_s13 = sld [smem:[%s6337_s0 + %s5590_s10]]   ;;  %s5593_s22 = smov 5  }
   0x4   :  { %s5650_s17 = sld [smem:[%s6337_s0 + %s5591_s14]]   ;;  %s5594_s26 = smov 6  }
   0x5   :  { %s5655_s21 = sld [smem:[%s6337_s0 + %s5592_s18]]   ;;  %s5595_s30 = smov 7  }
   0x6   :  { %s5660_s25 = sld [smem:[%s6337_s0 + %s5593_s22]]   ;;  %s5596_s4 = smov 8  }
   0x7   :  { %s5665_s29 = sld [smem:[%s6337_s0 + %s5594_s26]]   ;;  %s5597_s10 = smov 9  }
   0x8   :  { %s5670_s3 = sld [smem:[%s6337_s0 + %s5595_s30]]   ;;  %s5598_s15 = smov 10  }
   0x9   :  { %s5675_s8 = sld [smem:[%s6337_s0 + %s5596_s4]]   ;;  %s5599_s20 = smov 11  }
   0xa   :  { %s5680_s14 = sld [smem:[%s6337_s0 + %s5597_s10]]   ;;  %s5600_s26 = smov 12  }
   0xb   :  { %s5685_s19 = sld [smem:[%s6337_s0 + %s5598_s15]]   ;;  %s5601_s1 = smov 13  }
   0xc   :  { %s5690_s24 = sld [smem:[%s6337_s0 + %s5599_s20]]   ;;  %s5602_s7 = smov 14  }
   0xd   :  { %s5695_s30 = sld [smem:[%s6337_s0 + %s5600_s26]]   ;;  %s5603_s15 = smov 15  }
   0xe   :  { %s5700_s6 = sld [smem:[%s6337_s0 + %s5601_s1]]   ;;  %s5604_s22 = smov 16  }
   0xf   :  { %s5705_s12 = sld [smem:[%s6337_s0 + %s5602_s7]]   ;;  %s5605_s28 = smov 17  }
  0x10   :  { %s5710_s20 = sld [smem:[%s6337_s0 + %s5603_s15]]   ;;  %s5606_s7 = smov 18  }
  0x11   :  { %s5715_s27 = sld [smem:[%s6337_s0 + %s5604_s22]]   ;;  %s5607_s15 = smov 19  }
  0x12   :  { %s5720_s4 = sld [smem:[%s6337_s0 + %s5605_s28]]   ;;  %s5608_s22 = smov 20  }
  0x13   :  { %6345 = sst [smem:[#allocation2_spill]] %s5695_s30  ;;  %s5609_s28 = smov 21  }
  0x14   :  { %s5725_s30 = sld [smem:[%s6337_s0 + %s5606_s7]]   ;;  %s5610_s7 = smov 22  }
  0x16   :  { %6346 = sst [smem:[#allocation3_spill]] %s5710_s20 }
  0x17   :  { %6347 = sst [smem:[#allocation4_spill]] %s5715_s27 }
  0x18   :  { %6348 = sst [smem:[#allocation5_spill]] %s5720_s4 }
  0x19   :  { %s5730_s20 = sld [smem:[%s6337_s0 + %s5607_s15]]   ;;  %s5611_s15 = smov 23  }
  0x1a   :  { %6349 = sst [smem:[#allocation6_spill]] %s5725_s30 }
  0x1b   :  { %s5735_s27 = sld [smem:[%s6337_s0 + %s5608_s22]]   ;;  %s5612_s22 = smov 24  }
  0x1c   :  { %s5740_s4 = sld [smem:[%s6337_s0 + %s5609_s28]]   ;;  %s5613_s28 = smov 25  }
  0x1d   :  { %s5745_s30 = sld [smem:[%s6337_s0 + %s5610_s7]]   ;;  %s5614_s7 = smov 26  }
  0x1f   :  { %6350 = sst [smem:[#allocation7_spill]] %s5730_s20 }
  0x20   :  { %s5750_s20 = sld [smem:[%s6337_s0 + %s5611_s15]]   ;;  %s5615_s15 = smov 27  }
  0x21   :  { %6351 = sst [smem:[#allocation8_spill]] %s5735_s27 }
  0x22   :  { %6352 = sst [smem:[#allocation9_spill]] %s5740_s4 }
  0x23   :  { %6353 = sst [smem:[#allocation10_spill]] %s5745_s30 }
  0x24   :  { %s5755_s27 = sld [smem:[%s6337_s0 + %s5612_s22]]   ;;  %s5616_s22 = smov 28  }
  0x25   :  { %s5760_s4 = sld [smem:[%s6337_s0 + %s5613_s28]]   ;;  %s5617_s28 = smov 29  }
  0x26   :  { %6354 = sst [smem:[#allocation11_spill]] %s5750_s20 }
  0x27   :  { %s5765_s30 = sld [smem:[%s6337_s0 + %s5614_s7]]   ;;  %s5618_s7 = smov 30  }
  0x28   :  { %s5770_s20 = sld [smem:[%s6337_s0 + %s5615_s15]]   ;;  %s5787_s15 = smov 0  }
  0x2a   :  { %6355 = sst [smem:[#allocation12_spill]] %s5755_s27 }
  0x2b   :  { %6356 = sst [smem:[#allocation13_spill]] %s5760_s4 }
  0x2c   :  { %s5775_s27 = sld [smem:[%s6337_s0 + %s5616_s22]]  }
  0x2d   :  { %6357 = sst [smem:[#allocation14_spill]] %s5765_s30 }
  0x2e   :  { %s5780_s4 = sld [smem:[%s6337_s0 + %s5617_s28]]  }
  0x2f   :  { %s5785_s30 = sld [smem:[%s6337_s0 + %s5618_s7]]  }
  0x30 LB: > { %s5793_s16 = sadd.s32 4294967295, %s5587_s15   ;;  %p4405_p0 = scmp.ge.s32.totalorder %s5587_s15, 1  ;;  %s5587_s15 = sphi %s5787_s15, %s71_s15  }
  0x31   : > { %p844_p1 = scmp.lt.s32.totalorder %s5587_s15, 3 }
  0x33   : > { %p845_p2 = pnand %p4405_p0, %p844_p1 }
  0x34   : > { %s4406_s0 = sshll.u32 (!%p845_p2), %s5793_s16, 4  ;;  %s5619_s23 = smov (!%p845_p2), 48  }
  0x35   : > { %848 = sbr.rel (%p845_p2) target bundleno = 5582 (0x15ce), region = 140  ;;  %p922_p3 = scmp.lt.s32.totalorder (!%p845_p2), %s4406_s0, 31 }
  0x36   : > { %s5620_s26 = smov (!%p845_p2), 96   ;;  %s5621_s28 = smov (!%p845_p2), 16  }
  0x37   : > { %s5622_s1 = smov (!%p845_p2), 64   ;;  %s5623_s2 = smov (!%p845_p2), 112  }
  0x38   : > { %s5624_s7 = smov (!%p845_p2), 32   ;;  %s6358_s10 = sld [smem:[#allocation2_spill]] (!%p845_p2) }
  0x39   : > { %s6359_s11 = sld [smem:[#allocation3_spill]] (!%p845_p2)  ;;  %p927_p4 = scmp.lt.s32.totalorder (!%p845_p2), %s5793_s16, 1 }
  0x3a   : > { %v5456_v0 = vld [vmem:[%s5640_s9] sm:$0xff]   ;;  %s6372_s0 = smov (!%p922_p3, %s4406_s0), 31  ;;  %v5457_v9 = vld [vmem:[%s5640_s9 + $0x8] sm:$0xff]   ;;  %v5458_v10 = vld [vmem:[%s5640_s9 + $0x10] sm:$0xff]   ;;  %vm1669_vm0 = vcmask 392192   ;;  %vm1687_vm1 = vcmask 130048  }
  0x3b   : > { %4820 = vmatprep.mubr.bf16.mxu0 %v5456_v0  ;;  %s4407_s18 = sshll.u32 %s6372_s0, 2  ;;  %v5459_v11 = vld [vmem:[%s5640_s9 + $0x18] sm:$0xff]   ;;  %v5460_v12 = vld [vmem:[%s5640_s9 + $0x20] sm:$0xff]   ;;  %v5461_v13 = vld [vmem:[%s5640_s9 + $0x28] sm:$0xff]   ;;  %vm1678_vm2 = vcmask 785408   ;;  %vm1696_vm3 = vcmask 523264  }
  0x3c   : > { %s925_s22 = scalar_lea.vmem %s5635_s5, %s4407_s18  ;;  %v5462_v14 = vld [vmem:[%s5640_s9 + $0x30] sm:$0xff]   ;;  %v5463_v15 = vld [vmem:[%s5640_s9 + $0x38] sm:$0xff]   ;;  %v5464_v16 = vld [vmem:[%s5640_s9 + $0x40] sm:$0xff]   ;;  %vm1705_vm4 = vcmask 916480   ;;  %vm1714_vm5 = vcmask 261120   ;;  %vm1903_vm6 = vcmask 654336  }
  0x3d   : > { %v5448_v1 = vld [vmem:[%s925_s22 + $0x38] sm:$0xff]   ;;  %v5449_v2 = vld [vmem:[%s925_s22 + $0x30] sm:$0xff]   ;;  %v5450_v3 = vld [vmem:[%s925_s22 + $0x28] sm:$0xff]   ;;  %vm5626_vm7 = vmmov 0   ;;  %s6360_s0 = sld [smem:[#allocation4_spill]]  ;;  %vm3743_vm8 = vcmask 1043456  }
  0x3e   : > { %4804 = vmatprep.subr.bf16.mxu0 %v5448_v1  ;;  %v5451_v4 = vld [vmem:[%s925_s22 + $0x20] sm:$0xff]   ;;  %v5452_v5 = vld [vmem:[%s925_s22 + $0x18] sm:$0xff]   ;;  %v5453_v6 = vld [vmem:[%s925_s22 + $0x10] sm:$0xff]   ;;  %s6361_s18 = sld [smem:[#allocation7_spill]]  ;;  %vm3739_vm9 = vcmask 64512   ;;  %s6374_s16 = smov (!%p927_p4, %s5793_s16), 1 }
  0x3f   : > { %4805 = vmatpush3.bf16.msra.mxu0 %v5448_v1  ;;  %v5454_v7 = vld [vmem:[%s925_s22 + $0x8] sm:$0xff]   ;;  %v5455_v8 = vld [vmem:[%s925_s22] sm:$0xff]   ;;  %v5466_v18 = vld [vmem:[%s5640_s9 + $0x50] sm:$0xff]   ;;  %s6362_s22 = sld [smem:[#allocation8_spill]] }
  0x40   : > { %4806 = vmatprep.subr.bf16.mxu0 %v5449_v2  ;;  %v5465_v17 = vld [vmem:[%s5640_s9 + $0x48] sm:$0xff]   ;;  %v5467_v19 = vld [vmem:[%s5640_s9 + $0x58] sm:$0xff]   ;;  %v5468_v20 = vld [vmem:[%s5640_s9 + $0x60] sm:$0xff]  }
  0x41   : > { %v5469_v21 = vld [vmem:[%s5640_s9 + $0x68] sm:$0xff]   ;;  %v5470_v22 = vld [vmem:[%s5640_s9 + $0x70] sm:$0xff]   ;;  %v5471_v23 = vld [vmem:[%s5640_s9 + $0x78] sm:$0xff]  }
  0x42   : > { %v5472_v24 = vld [vmem:[%s5640_s9 + $0x80] sm:$0xff]   ;;  %v5473_v25 = vld [vmem:[%s5640_s9 + $0x88] sm:$0xff]   ;;  %v5474_v26 = vld [vmem:[%s5640_s9 + $0x90] sm:$0xff]  }
  0x43   : > { %4807 = vmatpush3.bf16.msra.mxu0 %v5449_v2  ;;  %v5475_v27 = vld [vmem:[%s5640_s9 + $0x98] sm:$0xff]   ;;  %v5476_v28 = vld [vmem:[%s5640_s9 + $0xa0] sm:$0xff]   ;;  %v5477_v29 = vld [vmem:[%s5640_s9 + $0xa8] sm:$0xff]  }
  0x44   : > { %4808 = vmatprep.subr.bf16.mxu0 %v5450_v3  ;;  %v5478_v30 = vld [vmem:[%s5640_s9 + $0xb0] sm:$0xff]   ;;  %v5479_v31 = vld [vmem:[%s5640_s9 + $0xb8] sm:$0xff]   ;;  %v5480_v32 = vld [vmem:[%s5640_s9 + $0xc0] sm:$0xff]  }
  0x45   : > { %v5481_v33 = vld [vmem:[%s5640_s9 + $0xc8] sm:$0xff]   ;;  %v5482_v34 = vld [vmem:[%s5640_s9 + $0xd0] sm:$0xff]   ;;  %v5483_v35 = vld [vmem:[%s5640_s9 + $0xd8] sm:$0xff]  }
  0x46   : > { %v5484_v1 = vld [vmem:[%s5645_s13 + $0x78] sm:$0xff]  }
  0x47   : > { %4809 = vmatpush3.bf16.msra.mxu0 %v5450_v3  ;;  %v5485_v2 = vld [vmem:[%s5645_s13 + $0x38] sm:$0xff]   ;;  %v5486_v3 = vld [vmem:[%s5645_s13 + $0x70] sm:$0xff]   ;;  %4635 = vmatprep.subr.bf16.mxu1 %v5484_v1 }
  0x48   : > { %4810 = vmatprep.subr.bf16.mxu0 %v5451_v4  ;;  %4636 = vmatpush3.bf16.msra.mxu1 %v5485_v2 }
  0x49   : > { %4637 = vmatprep.subr.bf16.mxu1 %v5486_v3 }
  0x4b   : > { %4811 = vmatpush3.bf16.msra.mxu0 %v5451_v4 }
  0x4c   : > { %4812 = vmatprep.subr.bf16.mxu0 %v5452_v5 }
  0x4f   : > { %4813 = vmatpush3.bf16.msra.mxu0 %v5452_v5  ;;  %v5487_v5 = vld [vmem:[%s5645_s13 + $0x30] sm:$0xff]  }
  0x50   : > { %4814 = vmatprep.subr.bf16.mxu0 %v5453_v6  ;;  %4638 = vmatpush3.bf16.msra.mxu1 %v5487_v5 }
  0x53   : > { %4815 = vmatpush3.bf16.msra.mxu0 %v5453_v6 }
  0x54   : > { %4816 = vmatprep.subr.bf16.mxu0 %v5454_v7 }
  0x57   : > { %4817 = vmatpush3.bf16.msra.mxu0 %v5454_v7  ;;  %v5488_v7 = vld [vmem:[%s5645_s13 + $0x68] sm:$0xff]  }
  0x58   : > { %4818 = vmatprep.subr.bf16.mxu0 %v5455_v8  ;;  %4639 = vmatprep.subr.bf16.mxu1 %v5488_v7 }
  0x5b   : > { %4819 = vmatpush3.bf16.msra.mxu0 %v5455_v8 }
  0x5e   : > { %4821 = vmatmul.mubr.bf16.vlgmr.msra.gmra.mxu0 %v5457_v9 }
  0x5f   : > { %4824 = vmatprep.mubr.bf16.mxu0 %v5458_v10  ;;  %v5489_v10 = vld [vmem:[%s5645_s13 + $0x28] sm:$0xff]  }
  0x60   : > { %4640 = vmatpush3.bf16.msra.mxu1 %v5489_v10 }
  0x66   : > { %4825 = vmatmul.mubr.bf16.gmra.mxu0 %v5459_v11 }
  0x67   : > { %4828 = vmatprep.mubr.bf16.mxu0 %v5460_v12 }
  0x6e   : > { %4829 = vmatmul.mubr.bf16.gmra.mxu0 %v5461_v13 }
  0x6f   : > { %4832 = vmatprep.mubr.bf16.mxu0 %v5462_v14 }
  0x76   : > { %4833 = vmatmul.mubr.bf16.gmra.mxu0 %v5463_v15 }
  0x77   : > { %4836 = vmatprep.mubr.bf16.mxu0 %v5464_v16  ;;  %v5490_v16 = vld [vmem:[%s5645_s13 + $0x60] sm:$0xff]  }
  0x78   : > { %4641 = vmatprep.subr.bf16.mxu1 %v5490_v16 }
  0x7e   : > { %4837 = vmatmul.mubr.bf16.gmra.mxu0 %v5465_v17  ;;  %v5491_v17 = vld [vmem:[%s5645_s13 + $0x20] sm:$0xff]  }
  0x7f   : > { %4840 = vmatprep.mubr.bf16.mxu0 %v5466_v18  ;;  %4642 = vmatpush3.bf16.msra.mxu1 %v5491_v17 }
  0x86   : > { %4841 = vmatmul.mubr.bf16.gmra.mxu0 %v5467_v19 }
  0x87   : > { %4844 = vmatprep.mubr.bf16.mxu0 %v5468_v20  ;;  %v5492_v20 = vld [vmem:[%s5645_s13 + $0x58] sm:$0xff]  }
  0x88   : > { %4643 = vmatprep.subr.bf16.mxu1 %v5492_v20 }
  0x8e   : > { %4845 = vmatmul.mubr.bf16.gmra.mxu0 %v5469_v21  ;;  %v5493_v21 = vld [vmem:[%s5645_s13 + $0x18] sm:$0xff]  }
  0x8f   : > { %4848 = vmatprep.mubr.bf16.mxu0 %v5470_v22  ;;  %4644 = vmatpush3.bf16.msra.mxu1 %v5493_v21 }
  0x96   : > { %4849 = vmatmul.mubr.bf16.gmra.mxu0 %v5471_v23  ;;  %v5494_v23 = vld [vmem:[%s5645_s13 + $0x50] sm:$0xff]  }
  0x97   : > { %4852 = vmatprep.mubr.bf16.mxu0 %v5472_v24  ;;  %v5495_v24 = vld [vmem:[%s5645_s13 + $0x10] sm:$0xff]   ;;  %4645 = vmatprep.subr.bf16.mxu1 %v5494_v23 }
  0x98   : > { %4646 = vmatpush3.bf16.msra.mxu1 %v5495_v24 }
  0x9e   : > { %4853 = vmatmul.mubr.bf16.gmra.mxu0 %v5473_v25 }
  0x9f   : > { %4856 = vmatprep.mubr.bf16.mxu0 %v5474_v26 }
  0xa6   : > { %4857 = vmatmul.mubr.bf16.gmra.mxu0 %v5475_v27 }
  0xa7   : > { %4860 = vmatprep.mubr.bf16.mxu0 %v5476_v28 }
  0xae   : > { %4861 = vmatmul.mubr.bf16.gmra.mxu0 %v5477_v29  ;;  %v5496_v29 = vld [vmem:[%s5645_s13 + $0x48] sm:$0xff]  }
  0xaf   : > { %4864 = vmatprep.mubr.bf16.mxu0 %v5478_v30  ;;  %v5497_v30 = vld [vmem:[%s5645_s13 + $0x8] sm:$0xff]   ;;  %4647 = vmatprep.subr.bf16.mxu1 %v5496_v29 }
  0xb0   : > { %4648 = vmatpush3.bf16.msra.mxu1 %v5497_v30 }
  0xb6   : > { %4865 = vmatmul.mubr.bf16.gmra.mxu0 %v5479_v31 }
  0xb7   : > { %4868 = vmatprep.mubr.bf16.mxu0 %v5480_v32 }
  0xbe   : > { %4869 = vmatmul.mubr.bf16.gmra.mxu0 %v5481_v33 }
  0xbf   : > { %4872 = vmatprep.mubr.bf16.mxu0 %v5482_v34  ;;  %v5498_v34 = vld [vmem:[%s5645_s13 + $0x40] sm:$0xff]  }
  0xc0   : > { %4649 = vmatprep.subr.bf16.mxu1 %v5498_v34 }
  0xc6   : > { %4873 = vmatmul.mubr.bf16.gmra.mxu0 %v5483_v35  ;;  %v5499_v35 = vld [vmem:[%s5645_s13] sm:$0xff]  }
  0xc7   : > { %4650 = vmatpush3.bf16.msra.mxu1 %v5499_v35 }
 0x11e   : > { %v5827_v36 = vpop.f32.mrf.mxu0 }
 0x120   : > { %v5829_v37 = vpop.f32.mrf.mxu0 }
 0x122   : > { %v5831_v38 = vpop.f32.mrf.mxu0 }
 0x124   : > { %v5833_v39 = vpop.f32.mrf.mxu0 }
 0x126   : > { %v5835_v40 = vpop.f32.mrf.mxu0 }
 0x128   : > { %v5837_v41 = vpop.f32.mrf.mxu0 }
 0x12a   : > { %v5839_v42 = vpop.f32.mrf.mxu0 }
 0x12c   : > { %v5841_v43 = vpop.f32.mrf.mxu0 }
 0x12e   : > { %v5843_v44 = vpop.f32.mrf.mxu0 }
 0x130   : > { %v1286_v45 = vpop.f32.mrf.mxu0 }
 0x132   : > { %v5845_v46 = vpop.f32.mrf.mxu0 }
 0x133   : > { %v5268_v47 = vpack.i.bf16 %v5845_v46, %v5843_v44 }
 0x134   : > { %v1289_v48 = vpop.f32.mrf.mxu0 }
 0x135   : > { %v5228_v49 = vpack.i.bf16 %v1289_v48, %v1286_v45 }
 0x136   : > { %v5849_v50 = vpop.f32.mrf.mxu0 }
 0x137   : > { %5229 = vrot.lane.b32.xlu1 %v5228_v49, %s5619_s23 }
 0x138   : > { %v5852_v51 = vpop.f32.mrf.mxu0 }
 0x13a   : > { %v5854_v52 = vpop.f32.mrf.mxu0 }
 0x13b   : > { %v5318_v53 = vpack.i.bf16 %v5854_v52, %v5849_v50 }
 0x13c   : > { %v5858_v54 = vpop.f32.mrf.mxu0 }
 0x13d   : > { %v5293_v3 = vpack.i.bf16 %v5858_v54, %v5852_v51 }
 0x13e   : > { %v4838_v55 = vpop.f32.mrf.mxu0 }
 0x140   : > { %v1318_v56 = vpop.f32.mrf.mxu0 }
 0x142   : > { %v4839_v57 = vpop.f32.mrf.mxu0 }
 0x143   : > { %v5233_v58 = vpack.i.bf16 %v4839_v57, %v4838_v55 }
 0x144   : > { %v1321_v59 = vpop.f32.mrf.mxu0 }
 0x145   : > { %v5238_v60 = vpack.i.bf16 %v1321_v59, %v1318_v56  ;;  %5234 = vrot.lane.b32.xlu1 %v5233_v58, %s5620_s26 }
 0x146   : > { %v5861_v61 = vpop.f32.mrf.mxu0 }
 0x147   : > { %5239 = vrot.lane.b32.xlu0 %v5238_v60, %s5620_s26 }
 0x148   : > { %v5864_v62 = vpop.f32.mrf.mxu0 }
 0x14a   : > { %v5866_v63 = vpop.f32.mrf.mxu0 }
 0x14c   : > { %v5868_v0 = vpop.f32.mrf.mxu0 }
 0x14e   : > { %v4846_v4 = vpop.f32.mrf.mxu0 }
 0x150   : > { %v1350_v6 = vpop.f32.mrf.mxu0 }
 0x152   : > { %v4847_v8 = vpop.f32.mrf.mxu0 }
 0x153   : > { %v5243_v9 = vpack.i.bf16 %v4847_v8, %v4846_v4  ;;  %v5904_v4 = vld [vmem:[%s5645_s13 + $0xa0] sm:$0xff]   ;;  %v5298_v8 = vpack.i.bf16 %v5866_v63, %v5861_v61 }
 0x154   : > { %v1353_v11 = vpop.f32.mrf.mxu0  ;;  %4876 = vmatprep.subr.bf16.mxu1 %v5904_v4 }
 0x155   : > { %5244 = vrot.lane.b32.xlu0 %v5243_v9, %s5621_s28  ;;  %v5248_v13 = vpack.i.bf16 %v1353_v11, %v1350_v6  ;;  %v5278_v6 = vpack.i.bf16 %v5868_v0, %v5864_v62 }
 0x156   : > { %v5877_v12 = vpop.f32.mrf.mxu0 }
 0x158   : > { %v1366_v14 = vpop.f32.mrf.mxu0 }
 0x159   : > { %5249 = vrot.lane.b32.xlu0 %v5248_v13, %s5621_s28 }
 0x15a   : > { %v5880_v15 = vpop.f32.mrf.mxu0 }
 0x15b   : > { %v5308_v61 = vpack.i.bf16 %v5880_v15, %v5877_v12 }
 0x15c   : > { %v1369_v18 = vpop.f32.mrf.mxu0 }
 0x15d   : > { %v5283_v60 = vpack.i.bf16 %v1369_v18, %v1366_v14 }
 0x15e   : > { %v4854_v19 = vpop.f32.mrf.mxu0 }
 0x160   : > { %v1382_v22 = vpop.f32.mrf.mxu0 }
 0x162   : > { %v4855_v25 = vpop.f32.mrf.mxu0 }
 0x163   : > { %v5258_v32 = vpack.i.bf16 %v4855_v25, %v4854_v19 }
 0x164   : > { %v1385_v26 = vpop.f32.mrf.mxu0 }
 0x165   : > { %v5253_v27 = vpack.i.bf16 %v1385_v26, %v1382_v22 }
 0x166   : > { %v4858_v28 = vpop.f32.mrf.mxu0 }
 0x167   : > { %5254 = vrot.lane.b32.xlu1 %v5253_v27, %s5622_s1 }
 0x168   : > { %v1398_v31 = vpop.f32.mrf.mxu0 }
 0x16a   : > { %v4859_v33 = vpop.f32.mrf.mxu0 }
 0x16b   : > { %5259 = vrot.lane.b32.xlu1 %v5258_v32, %s5622_s1  ;;  %v5313_v46 = vpack.i.bf16 %v4859_v33, %v4858_v28 }
 0x16c   : > { %v1401_v45 = vpop.f32.mrf.mxu0 }
 0x16d   : > { %v5288_v54 = vpack.i.bf16 %v1401_v45, %v1398_v31 }
 0x16e   : > { %v4862_v48 = vpop.f32.mrf.mxu0 }
 0x170   : > { %v1414_v49 = vpop.f32.mrf.mxu0 }
 0x172   : > { %v4863_v55 = vpop.f32.mrf.mxu0 }
 0x173   : > { %v5273_v56 = vpack.i.bf16 %v4863_v55, %v4862_v48 }
 0x174   : > { %v1417_v57 = vpop.f32.mrf.mxu0 }
 0x175   : > { %v5263_v58 = vpack.i.bf16 %v1417_v57, %v1414_v49  ;;  %5274 = vrot.lane.b32.xlu1 %v5273_v56, %s5623_s2 }
 0x176   : > { %v4866_v59 = vpop.f32.mrf.mxu0 }
 0x177   : > { %5264 = vrot.lane.b32.xlu0 %v5263_v58, %s5623_s2 }
 0x178   : > { %v1430_v1 = vpop.f32.mrf.mxu0 }
 0x179   : > { %5284 = vrot.lane.b32.xlu1 %v5283_v60, %s5621_s28 }
 0x17a   : > { %v4867_v2 = vpop.f32.mrf.mxu0 }
 0x17b   : > { %5269 = vrot.lane.b32.xlu0 %v5268_v47, %s5619_s23  ;;  %v5323_v9 = vpack.i.bf16 %v4867_v2, %v4866_v59 }
 0x17c   : > { %v1433_v5 = vpop.f32.mrf.mxu0 }
 0x17d   : > { %5294 = vrot.lane.b32.xlu1 %v5293_v3, %s5619_s23  ;;  %v5303_v62 = vpack.i.bf16 %v1433_v5, %v1430_v1 }
 0x17e   : > { %v4870_v7 = vpop.f32.mrf.mxu0 }
 0x17f   : > { %5279 = vrot.lane.b32.xlu0 %v5278_v6, %s5620_s26 }
 0x180   : > { %v1446_v51 = vpop.f32.mrf.mxu0 }
 0x181   : > { %5299 = vrot.lane.b32.xlu1 %v5298_v8, %s5620_s26 }
 0x182   : > { %v4871_v44 = vpop.f32.mrf.mxu0 }
 0x183   : > { %5289 = vrot.lane.b32.xlu0 %v5288_v54, %s5622_s1  ;;  %v5333_v63 = vpack.i.bf16 %v4871_v44, %v4870_v7 }
 0x184   : > { %v1449_v47 = vpop.f32.mrf.mxu0 }
 0x185   : > { %5314 = vrot.lane.b32.xlu1 %v5313_v46, %s5622_s1  ;;  %v5328_v16 = vpack.i.bf16 %v1449_v47, %v1446_v51 }
 0x186   : > { %v4874_v0 = vpop.f32.mrf.mxu0 }
 0x187   : > { %5304 = vrot.lane.b32.xlu0 %v5303_v62, %s5623_s2 }
 0x188   : > { %v1462_v10 = vpop.f32.mrf.mxu0 }
 0x189   : > { %5324 = vrot.lane.b32.xlu1 %v5323_v9, %s5623_s2  ;;  %s6367_s2 = sld [smem:[#allocation13_spill]] }
 0x18a   : > { %v4875_v11 = vpop.f32.mrf.mxu0 }
 0x18b   : > { %5309 = vrot.lane.b32.xlu0 %v5308_v61, %s5621_s28  ;;  %v5343_v13 = vpack.i.bf16 %v4875_v11, %v4874_v0  ;;  %s6365_s28 = sld [smem:[#allocation10_spill]] }
 0x18c   : > { %v1465_v14 = vpop.f32.mrf.mxu0 }
 0x18d   : > { %5334 = vrot.lane.b32.xlu1 %v5333_v63, %s5624_s7  ;;  %v5338_v12 = vpack.i.bf16 %v1465_v14, %v1462_v10  ;;  %v5501_v10 = vld [vmem:[%s5645_s13 + $0x98] sm:$0xff]  }
 0x18f   : > { %5319 = vrot.lane.b32.xlu0 %v5318_v53, %s5619_s23  ;;  %s6363_s23 = sld [smem:[#allocation5_spill]] }
 0x191   : > { %5344 = vrot.lane.b32.xlu1 %v5343_v13, %s5624_s7 }
 0x193   : > { %5329 = vrot.lane.b32.xlu0 %v5328_v16, %s5624_s7  ;;  %v5502_v16 = vld [vmem:[%s5645_s13 + $0x90] sm:$0xff]  }
 0x197   : > { %5339 = vrot.lane.b32.xlu0 %v5338_v12, %s5624_s7 }
 0x1a9   : > { %v5230_v15 = vpop.permute.xlu1 %5229 }
 0x1aa   : > { %v5232_v52 = vunpack.i.h.bf16 %v5230_v15  ;;  %v5231_v53 = vunpack.i.l.bf16 %v5230_v15 }
 0x1ac   : > { %v1671_v35 = vsel %vm1669_vm0, %v5833_v39, %v5232_v52  ;;  %v1670_v45 = vsel %vm1669_vm0, %v5829_v37, %v5231_v53 }
 0x1b7   : > { %v5929_v17 = vpop.permute.xlu1 %5234 }
 0x1b8   : > { %v5237_v26 = vunpack.i.h.bf16 %v5929_v17  ;;  %v5236_v27 = vunpack.i.l.bf16 %v5929_v17 }
 0x1b9   : > { %v5240_v18 = vpop.permute.xlu0 %5239 }
 0x1ba   : > { %v5242_v22 = vunpack.i.h.bf16 %v5240_v18  ;;  %v5241_v23 = vunpack.i.l.bf16 %v5240_v18 }
 0x1bc   : > { %v1679_v58 = vsel %vm1678_vm2, %v1670_v45, %v5241_v23  ;;  %v1680_v59 = vsel %vm1678_vm2, %v1671_v35, %v5242_v22 }
 0x1bd   : > { %v1723_v9 = vpack.c.bf16 %v1680_v59, %v1679_v58 }
 0x1c7   : > { %v5245_v19 = vpop.permute.xlu0 %5244 }
 0x1c8   : > { %v5247_v24 = vunpack.i.h.bf16 %v5245_v19  ;;  %v5246_v25 = vunpack.i.l.bf16 %v5245_v19 }
 0x1ca   : > { %v1691_v55 = vsel %vm1687_vm1, %v5237_v26, %v5247_v24  ;;  %v1690_v56 = vsel %vm1687_vm1, %v5236_v27, %v5246_v25 }
 0x1cb   : > { %v5250_v21 = vpop.permute.xlu0 %5249 }
 0x1cc   : > { %v5252_v28 = vunpack.i.h.bf16 %v5250_v21  ;;  %v5251_v29 = vunpack.i.l.bf16 %v5250_v21 }
 0x1ce   : > { %v1688_v37 = vsel %vm1687_vm1, %v5241_v23, %v5251_v29  ;;  %v1689_v1 = vsel %vm1687_vm1, %v5242_v22, %v5252_v28 }
 0x1d9   : > { %v5255_v20 = vpop.permute.xlu1 %5254 }
 0x1da   : > { %v5257_v30 = vunpack.i.h.bf16 %v5255_v20  ;;  %v5256_v31 = vunpack.i.l.bf16 %v5255_v20 }
 0x1dc   : > { %v1697_v6 = vsel %vm1696_vm3, %v1688_v37, %v5256_v31  ;;  %v1698_v7 = vsel %vm1696_vm3, %v1689_v1, %v5257_v30  ;;  %v5504_v31 = vld [vmem:[%s5645_s13 + $0x80] sm:$0xff]  }
 0x1dd   : > { %v5260_v50 = vpop.permute.xlu1 %5259 }
 0x1de   : > { %v5262_v32 = vunpack.i.h.bf16 %v5260_v50  ;;  %v5261_v33 = vunpack.i.l.bf16 %v5260_v50  ;;  %v5503_v50 = vld [vmem:[%s5645_s13 + $0x88] sm:$0xff]  }
 0x1e0   : > { %v1700_v2 = vsel %vm1696_vm3, %v1691_v55, %v5262_v32  ;;  %v1699_v3 = vsel %vm1696_vm3, %v1690_v56, %v5261_v33 }
 0x1e7   : > { %v5933_v34 = vpop.permute.xlu1 %5274 }
 0x1e8   : > { %v5277_v48 = vunpack.i.h.bf16 %v5933_v34  ;;  %v5276_v49 = vunpack.i.l.bf16 %v5933_v34 }
 0x1e9   : > { %v5943_v57 = vpop.permute.xlu0 %5264 }
 0x1ea   : > { %v5267_v60 = vunpack.i.h.bf16 %v5943_v57  ;;  %v5266_v39 = vunpack.i.l.bf16 %v5943_v57  ;;  %v1708_v54 = vsel %vm1705_vm4, %v1699_v3, %v5276_v49  ;;  %v1709_v44 = vsel %vm1705_vm4, %v1700_v2, %v5277_v48 }
 0x1eb   : > { %v5285_v5 = vpop.permute.xlu1 %5284  ;;  %v1727_v63 = vpack.c.bf16 %v1709_v44, %v1708_v54 }
 0x1ec   : > { %v1706_v8 = vsel %vm1705_vm4, %v1697_v6, %v5266_v39  ;;  %v1707_v51 = vsel %vm1705_vm4, %v1698_v7, %v5267_v60  ;;  %v5287_v53 = vunpack.i.h.bf16 %v5285_v5  ;;  %v5286_v22 = vunpack.i.l.bf16 %v5285_v5 }
 0x1ed   : > { %v5270_v46 = vpop.permute.xlu0 %5269  ;;  %v1724_v47 = vpack.c.bf16 %v1707_v51, %v1706_v8 }
 0x1ee   : > { %v5272_v62 = vunpack.i.h.bf16 %v5270_v46  ;;  %v5271_v0 = vunpack.i.l.bf16 %v5270_v46 }
 0x1ef   : > { %v5295_v61 = vpop.permute.xlu1 %5294  ;;  %1948 = vmatprep.mubr.bf16.mxu1 %v1724_v47 }
 0x1f0   : > { %v1673_v11 = vsel %vm1669_vm0, %v5831_v38, %v5272_v62  ;;  %v1672_v13 = vsel %vm1669_vm0, %v5827_v36, %v5271_v0  ;;  %1949 = vmatmul.mubr.bf16.vlgmr.msra.gmra.mxu1 %v1723_v9  ;;  %v5297_v18 = vunpack.i.h.bf16 %v5295_v61  ;;  %v5296_v19 = vunpack.i.l.bf16 %v5295_v61 }
 0x1f1   : > { %v5280_v14 = vpop.permute.xlu0 %5279  ;;  %1956 = vmatprep.mubr.bf16.mxu1 %v1727_v63  ;;  %4877 = vmatpush3.bf16.msra.mxu1 %v5904_v4  ;;  %v1681_v15 = vsel %vm1678_vm2, %v1672_v13, %v5236_v27  ;;  %v1682_v17 = vsel %vm1678_vm2, %v1673_v11, %v5237_v26 }
 0x1f2   : > { %4878 = vmatprep.subr.bf16.mxu1 %v5501_v10  ;;  %v5282_v20 = vunpack.i.h.bf16 %v5280_v14  ;;  %v5281_v36 = vunpack.i.l.bf16 %v5280_v14  ;;  %v1726_v21 = vpack.c.bf16 %v1682_v17, %v1681_v15  ;;  %v1675_v23 = vsel %vm1669_vm0, %v5841_v43, %v5297_v18 }
 0x1f3   : > { %v5974_v12 = vpop.permute.xlu1 %5299  ;;  %v1674_v24 = vsel %vm1669_vm0, %v5837_v41, %v5296_v19 }
 0x1f4   : > { %v1693_v27 = vsel %vm1687_vm1, %v5282_v20, %v5287_v53  ;;  %v1692_v28 = vsel %vm1687_vm1, %v5281_v36, %v5286_v22  ;;  %v1683_v41 = vsel %vm1678_vm2, %v1674_v24, %v5281_v36  ;;  %v1684_v33 = vsel %vm1678_vm2, %v1675_v23, %v5282_v20 }
 0x1f5   : > { %v5290_v38 = vpop.permute.xlu0 %5289  ;;  %4879 = vmatpush3.bf16.msra.mxu1 %v5501_v10  ;;  %v5302_v55 = vunpack.i.h.bf16 %v5974_v12  ;;  %v5301_v59 = vunpack.i.l.bf16 %v5974_v12  ;;  %v1729_v3 = vpack.c.bf16 %v1684_v33, %v1683_v41 }
 0x1f6   : > { %4880 = vmatprep.subr.bf16.mxu1 %v5502_v16  ;;  %v5292_v52 = vunpack.i.h.bf16 %v5290_v38  ;;  %v5291_v4 = vunpack.i.l.bf16 %v5290_v38 }
 0x1f7   : > { %v5315_v25 = vpop.permute.xlu1 %5314 }
 0x1f8   : > { %1957 = vmatmul.mubr.bf16.gmra.mxu1 %v1726_v21  ;;  %v1701_v43 = vsel %vm1696_vm3, %v1692_v28, %v5291_v4  ;;  %v1702_v32 = vsel %vm1696_vm3, %v1693_v27, %v5292_v52  ;;  %v5317_v5 = vunpack.i.h.bf16 %v5315_v25  ;;  %v5316_v6 = vunpack.i.l.bf16 %v5315_v25  ;;  %v5505_v25 = vld [vmem:[%s5650_s17 + $0x18] sm:$0xff]   ;;  %v5507_v27 = vld [vmem:[%s5650_s17 + $0x8] sm:$0xff]   ;;  %v5508_v28 = vld [vmem:[%s5650_s17] sm:$0xff]  }
 0x1f9   : > { %v5983_v26 = vpop.permute.xlu0 %5304  ;;  %4881 = vmatpush3.bf16.msra.mxu1 %v5502_v16 }
 0x1fa   : > { %v5307_v29 = vunpack.i.h.bf16 %v5983_v26  ;;  %v5306_v30 = vunpack.i.l.bf16 %v5983_v26  ;;  %4882 = vmatprep.subr.bf16.mxu1 %v5503_v50  ;;  %v5506_v26 = vld [vmem:[%s5650_s17 + $0x10] sm:$0xff]  }
 0x1fb   : > { %v5325_v37 = vpop.permute.xlu1 %5324 }
 0x1fc   : > { %v1710_v35 = vsel %vm1705_vm4, %v1701_v43, %v5306_v30  ;;  %v1711_v45 = vsel %vm1705_vm4, %v1702_v32, %v5307_v29  ;;  %v5327_v51 = vunpack.i.h.bf16 %v5325_v37  ;;  %v5326_v54 = vunpack.i.l.bf16 %v5325_v37 }
 0x1fd   : > { %v5310_v56 = vpop.permute.xlu0 %5309  ;;  %v1730_v58 = vpack.c.bf16 %v1711_v45, %v1710_v35  ;;  %4883 = vmatpush3.bf16.msra.mxu1 %v5503_v50 }
 0x1fe   : > { %v5312_v1 = vunpack.i.h.bf16 %v5310_v56  ;;  %v5311_v2 = vunpack.i.l.bf16 %v5310_v56  ;;  %4884 = vmatprep.subr.bf16.mxu1 %v5504_v31 }
 0x1ff   : > { %1964 = vmatprep.mubr.bf16.mxu1 %v1730_v58  ;;  %v5335_v11 = vpop.permute.xlu1 %5334 }
 0x200   : > { %v1695_v7 = vsel %vm1687_vm1, %v5302_v55, %v5312_v1  ;;  %v1694_v8 = vsel %vm1687_vm1, %v5301_v59, %v5311_v2  ;;  %1965 = vmatmul.mubr.bf16.gmra.mxu1 %v1729_v3  ;;  %v5337_v19 = vunpack.i.h.bf16 %v5335_v11  ;;  %v5336_v38 = vunpack.i.l.bf16 %v5335_v11 }
 0x201   : > { %v5320_v44 = vpop.permute.xlu0 %5319  ;;  %v1703_v46 = vsel %vm1696_vm3, %v1694_v8, %v5316_v6  ;;  %v1704_v47 = vsel %vm1696_vm3, %v1695_v7, %v5317_v5  ;;  %4885 = vmatpush3.bf16.msra.mxu1 %v5504_v31 }
 0x202   : > { %v5322_v62 = vunpack.i.h.bf16 %v5320_v44  ;;  %v5321_v0 = vunpack.i.l.bf16 %v5320_v44  ;;  %v1712_v9 = vsel %vm1705_vm4, %v1703_v46, %v5326_v54  ;;  %v1713_v10 = vsel %vm1705_vm4, %v1704_v47, %v5327_v51  ;;  %4894 = vmatprep.subr.bf16.mxu1 %v5505_v25 }
 0x203   : > { %v1733_v13 = vpack.c.bf16 %v1713_v10, %v1712_v9  ;;  %v1718_v52 = vsel %vm1714_vm5, %v5277_v48, %v5337_v19  ;;  %v5345_v4 = vpop.permute.xlu1 %5344 }
 0x204   : > { %v1677_v61 = vsel %vm1669_vm0, %v5839_v42, %v5322_v62  ;;  %v1676_v63 = vsel %vm1669_vm0, %v5835_v40, %v5321_v0  ;;  %v5347_v22 = vunpack.i.h.bf16 %v5345_v4  ;;  %v5346_v23 = vunpack.i.l.bf16 %v5345_v4 }
 0x205   : > { %v5330_v14 = vpop.permute.xlu0 %5329  ;;  %v1685_v16 = vsel %vm1678_vm2, %v1676_v63, %v5301_v59  ;;  %v1686_v12 = vsel %vm1678_vm2, %v1677_v61, %v5302_v55  ;;  %1972 = vmatprep.mubr.bf16.mxu1 %v1733_v13 }
 0x206   : > { %v5332_v15 = vunpack.i.h.bf16 %v5330_v14  ;;  %v5331_v17 = vunpack.i.l.bf16 %v5330_v14  ;;  %v1732_v18 = vpack.c.bf16 %v1686_v12, %v1685_v16  ;;  %v1722_v34 = vsel %vm1714_vm5, %v5327_v51, %v5347_v22 }
 0x207   : > { %v1721_v48 = vsel %vm1714_vm5, %v5326_v54, %v5346_v23 }
 0x208   : > { %v1716_v42 = vsel %vm1714_vm5, %v5267_v60, %v5332_v15  ;;  %v1715_v40 = vsel %vm1714_vm5, %v5266_v39, %v5331_v17  ;;  %1973 = vmatmul.mubr.bf16.gmra.mxu1 %v1732_v18  ;;  %v1717_v60 = vsel %vm1714_vm5, %v5276_v49, %v5336_v38  ;;  %v1734_v49 = vpack.c.bf16 %v1722_v34, %v1721_v48 }
 0x209   : > { %v1725_v20 = vpack.c.bf16 %v1716_v42, %v1715_v40  ;;  %v5340_v36 = vpop.permute.xlu0 %5339  ;;  %v1728_v53 = vpack.c.bf16 %v1718_v52, %v1717_v60 }
 0x20a   : > { %v5342_v21 = vunpack.i.h.bf16 %v5340_v36  ;;  %v5341_v50 = vunpack.i.l.bf16 %v5340_v36 }
 0x20b   : > { %4886 = vmatprep.mubr.msk.bf16.mxu1 %vm1903_vm6, %v1725_v20 }
 0x20c   : > { %v1720_v57 = vsel %vm1714_vm5, %v5307_v29, %v5342_v21  ;;  %v1719_v39 = vsel %vm1714_vm5, %v5306_v30, %v5341_v50 }
 0x20d   : > { %v1731_v24 = vpack.c.bf16 %v1720_v57, %v1719_v39 }
 0x210   : > { %4887 = vmatmul.mubr.msk.bf16.vlgmr.msra.gmra.mxu1 %vm1903_vm6, %v1728_v53 }
 0x211   : > { %4890 = vmatprep.mubr.msk.bf16.mxu1 %vm1903_vm6, %v1731_v24  ;;  %4895 = vmatpush3.bf16.msra.mxu1 %v5505_v25 }
 0x212   : > { %4896 = vmatprep.subr.bf16.mxu1 %v5506_v26 }
 0x215   : > { %4897 = vmatpush3.bf16.msra.mxu1 %v5506_v26 }
 0x216   : > { %4898 = vmatprep.subr.bf16.mxu1 %v5507_v27 }
 0x218   : > { %4891 = vmatmul.mubr.msk.bf16.gmra.mxu1 %vm1903_vm6, %v1734_v49 }
 0x219   : > { %4899 = vmatpush3.bf16.msra.mxu1 %v5507_v27 }
 0x21a   : > { %4900 = vmatprep.subr.bf16.mxu1 %v5508_v28 }
 0x21d   : > { %4901 = vmatpush3.bf16.msra.mxu1 %v5508_v28  ;;  %v5509_v28 = vld [vmem:[%s5655_s21] sm:$0xff]  }
 0x2b0   : > { %v4651_v29 = vpop.f32.mrf.mxu1 }
 0x2b2   : > { %v4652_v30 = vpop.f32.mrf.mxu1 }
 0x2b3   : > { %v4653_v6 = vadd.f32 %v4652_v30, %v4651_v29 }
 0x2b4   : > { %v4654_v31 = vpop.f32.mrf.mxu1 }
 0x2b6   : > { %v4655_v43 = vpop.f32.mrf.mxu1 }
 0x2b7   : > { %v4656_v54 = vadd.f32 %v4655_v43, %v4654_v31 }
 0x2b8   : > { %v4657_v32 = vpop.f32.mrf.mxu1 }
 0x2ba   : > { %v4658_v41 = vpop.f32.mrf.mxu1 }
 0x2bb   : > { %v4659_v8 = vadd.f32 %v4658_v41, %v4657_v32 }
 0x2bc   : > { %v4660_v33 = vpop.f32.mrf.mxu1 }
 0x2be   : > { %v4661_v35 = vpop.f32.mrf.mxu1 }
 0x2bf   : > { %v4662_v7 = vadd.f32 %v4661_v35, %v4660_v33 }
 0x2c0   : > { %v4663_v45 = vpop.f32.mrf.mxu1 }
 0x2c2   : > { %v4664_v55 = vpop.f32.mrf.mxu1 }
 0x2c3   : > { %v4665_v14 = vadd.f32 %v4664_v55, %v4663_v45 }
 0x2c4   : > { %v4666_v56 = vpop.f32.mrf.mxu1 }
 0x2c6   : > { %v4667_v58 = vpop.f32.mrf.mxu1 }
 0x2c7   : > { %v4668_v19 = vadd.f32 %v4667_v58, %v4666_v56 }
 0x2c8   : > { %v4669_v59 = vpop.f32.mrf.mxu1 }
 0x2ca   : > { %v4670_v37 = vpop.f32.mrf.mxu1 }
 0x2cb   : > { %v4671_v15 = vadd.f32 %v4670_v37, %v4669_v59 }
 0x2cc   : > { %v4672_v1 = vpop.f32.mrf.mxu1 }
 0x2ce   : > { %v4673_v2 = vpop.f32.mrf.mxu1 }
 0x2cf   : > { %v4674_v16 = vadd.f32 %v4673_v2, %v4672_v1 }
 0x2d0   : > { %v4888_v3 = vpop.f32.mrf.mxu1 }
 0x2d1   : > { %v2024_v47 = vadd.f32 %v4888_v3, %v4659_v8 }
 0x2d2   : > { %v2015_v5 = vpop.f32.mrf.mxu1 }
 0x2d3   : > { %v2016_v44 = vadd.f32 %v4653_v6, %v2015_v5  ;;  %v2048_v11 = vmax.f32 %v2024_v47, 0.0 }
 0x2d4   : > { %v4889_v51 = vpop.f32.mrf.mxu1 }
 0x2d5   : > { %v2027_v46 = vadd.f32 %v4889_v51, %v4662_v7  ;;  %v2046_v61 = vmax.f32 %v2016_v44, 0.0 }
 0x2d6   : > { %v2018_v62 = vpop.f32.mrf.mxu1 }
 0x2d7   : > { %v2019_v0 = vadd.f32 %v4656_v54, %v2018_v62  ;;  %v2049_v9 = vmax.f32 %v2027_v46, 0.0 }
 0x2d8   : > { %v4892_v10 = vpop.f32.mrf.mxu1 }
 0x2d9   : > { %v2047_v63 = vmax.f32 %v2019_v0, 0.0  ;;  %v2055_v17 = vpack.c.bf16 %v2049_v9, %v2048_v11  ;;  %v2040_v40 = vadd.f32 %v4892_v10, %v4671_v15 }
 0x2da   : > { %v2031_v13 = vpop.f32.mrf.mxu1 }
 0x2db   : > { %v2054_v12 = vpack.c.bf16 %v2047_v63, %v2046_v61  ;;  %v2032_v38 = vadd.f32 %v4665_v14, %v2031_v13  ;;  %v2052_v60 = vmax.f32 %v2040_v40, 0.0 }
 0x2dc   : > { %v4893_v18 = vpop.f32.mrf.mxu1 }
 0x2dd   : > { %v2043_v42 = vadd.f32 %v4893_v18, %v4674_v16  ;;  %4902 = vmatprep.mubr.msk.bf16.mxu1 %vm1696_vm3, %v2054_v12  ;;  %v2050_v50 = vmax.f32 %v2032_v38, 0.0 }
 0x2de   : > { %v2034_v20 = vpop.f32.mrf.mxu1  ;;  %4903 = vmatmul.mubr.msk.bf16.vlgmr.msra.gmra.mxu1 %vm1696_vm3, %v2055_v17 }
 0x2df   : > { %v2035_v36 = vadd.f32 %v4668_v19, %v2034_v20  ;;  %v2053_v21 = vmax.f32 %v2043_v42, 0.0 }
 0x2e1   : > { %v2051_v52 = vmax.f32 %v2035_v36, 0.0  ;;  %v2057_v57 = vpack.c.bf16 %v2053_v21, %v2052_v60  ;;  %v5510_v36 = vld [vmem:[%s5655_s21 + $0x8] sm:$0xff]   ;;  %v5511_v21 = vld [vmem:[%s5655_s21 + $0x10] sm:$0xff]  }
 0x2e2   : > { %v5514_v60 = vld [vmem:[%s5655_s21 + $0x28] sm:$0xff]  }
 0x2e3   : > { %v2056_v4 = vpack.c.bf16 %v2051_v52, %v2050_v50  ;;  %v5512_v50 = vld [vmem:[%s5655_s21 + $0x18] sm:$0xff]   ;;  %v5513_v52 = vld [vmem:[%s5655_s21 + $0x20] sm:$0xff]  }
 0x2e5   : > { %4906 = vmatprep.mubr.msk.bf16.mxu1 %vm1696_vm3, %v2056_v4  ;;  %v5515_v4 = vld [vmem:[%s5660_s25] sm:$0xff]  }
 0x2e6   : > { %4907 = vmatmul.mubr.msk.bf16.gmra.mxu1 %vm1696_vm3, %v2057_v57 }
 0x2e7   : > { %4918 = vmatprep.mubr.msk.bf16.mxu1 %vm1696_vm3, %v5509_v28 }
 0x39e   : > { %v4904_v39 = vpop.f32.mrf.mxu1 }
 0x3a0   : > { %v6046_v53 = vpop.f32.mrf.mxu1 }
 0x3a2   : > { %v4905_v22 = vpop.f32.mrf.mxu1 }
 0x3a3   : > { %v5373_v27 = vpack.i.bf16 %v4905_v22, %v4904_v39 }
 0x3a4   : > { %v2139_v23 = vpop.f32.mrf.mxu1 }
 0x3a5   : > { %v5383_v29 = vpack.i.bf16 %v2139_v23, %v6046_v53 }
 0x3a6   : > { %v4908_v24 = vpop.f32.mrf.mxu1 }
 0x3a8   : > { %v2152_v34 = vpop.f32.mrf.mxu1 }
 0x3aa   : > { %v4909_v48 = vpop.f32.mrf.mxu1 }
 0x3ab   : > { %v5353_v49 = vpack.i.bf16 %v4909_v48, %v4908_v24 }
 0x3ac   : > { %v2155_v25 = vpop.f32.mrf.mxu1 }
 0x3ad   : > { %5354 = vrot.lane.b32.xlu1 %v5353_v49, %s5622_s1  ;;  %5349 = vrot.lane.b32.xlu0 %v5353_v49, %s5620_s26  ;;  %v5368_v26 = vpack.i.bf16 %v2155_v25, %v2152_v34 }
 0x3b1   : > { %5369 = vrot.lane.b32.xlu1 %v5368_v26, %s5622_s1  ;;  %5359 = vrot.lane.b32.xlu0 %v5368_v26, %s5620_s26 }
 0x3b5   : > { %5374 = vrot.lane.b32.xlu1 %v5373_v27, %s5622_s1  ;;  %5364 = vrot.lane.b32.xlu0 %v5373_v27, %s5620_s26 }
 0x3b9   : > { %5384 = vrot.lane.b32.xlu1 %v5383_v29, %s5622_s1  ;;  %5379 = vrot.lane.b32.xlu0 %v5383_v29, %s5620_s26  ;;  %s6364_s26 = sld [smem:[#allocation6_spill]] }
 0x41f   : > { %v5355_v30 = vpop.permute.xlu1 %5354  ;;  %v5350_v31 = vpop.permute.xlu0 %5349 }
 0x420   : > { %v5352_v43 = vunpack.i.h.bf16 %v5350_v31  ;;  %v5351_v32 = vunpack.i.l.bf16 %v5350_v31  ;;  %v5357_v41 = vunpack.i.h.bf16 %v5355_v30  ;;  %v5356_v33 = vunpack.i.l.bf16 %v5355_v30 }
 0x422   : > { %v2206_v35 = vmax.f32 %v4909_v48, %v5352_v43  ;;  %v2205_v45 = vmax.f32 %v4908_v24, %v5351_v32 }
 0x423   : > { %v5370_v55 = vpop.permute.xlu1 %5369  ;;  %v5360_v56 = vpop.permute.xlu0 %5359 }
 0x424   : > { %v2238_v58 = vmax.f32 %v2206_v35, %v5357_v41  ;;  %v2237_v59 = vmax.f32 %v2205_v45, %v5356_v33  ;;  %v5362_v37 = vunpack.i.h.bf16 %v5360_v56  ;;  %v5361_v1 = vunpack.i.l.bf16 %v5360_v56  ;;  %v5517_v56 = vld [vmem:[%s5660_s25 + $0x10] sm:$0xff]  }
 0x425   : > { %v5372_v3 = vunpack.i.h.bf16 %v5370_v55  ;;  %v5371_v5 = vunpack.i.l.bf16 %v5370_v55  ;;  %v5516_v55 = vld [vmem:[%s5660_s25 + $0x8] sm:$0xff]  }
 0x426   : > { %v2254_v2 = vpack.c.bf16 %v2238_v58, %v2237_v59  ;;  %v2204_v6 = vmax.f32 %v2155_v25, %v5362_v37  ;;  %v2203_v7 = vmax.f32 %v2152_v34, %v5361_v1  ;;  %v5518_v58 = vld [vmem:[%s5660_s25 + $0x18] sm:$0xff]   ;;  %v5519_v59 = vld [vmem:[%s5660_s25 + $0x20] sm:$0xff]   ;;  %v5520_v37 = vld [vmem:[%s5660_s25 + $0x28] sm:$0xff]  }
 0x427   : > { %v5375_v8 = vpop.permute.xlu1 %5374  ;;  %v5365_v51 = vpop.permute.xlu0 %5364  ;;  %v5521_v1 = vld [vmem:[%s5665_s29 + $0x28] sm:$0xff]  }
 0x428   : > { %v5367_v54 = vunpack.i.h.bf16 %v5365_v51  ;;  %v5366_v44 = vunpack.i.l.bf16 %v5365_v51  ;;  %4910 = vmatprep.subr.bf16.mxu1 %v2254_v2  ;;  %v2236_v46 = vmax.f32 %v2204_v6, %v5372_v3  ;;  %v2235_v47 = vmax.f32 %v2203_v7, %v5371_v5  ;;  %v5523_v5 = vld [vmem:[%s5665_s29 + $0x18] sm:$0xff]  }
 0x429   : > { %4911 = vmatpush3.bf16.msra.mxu1 %v2254_v2  ;;  %v5377_v62 = vunpack.i.h.bf16 %v5375_v8  ;;  %v5376_v0 = vunpack.i.l.bf16 %v5375_v8  ;;  %v5522_v2 = vld [vmem:[%s5665_s29 + $0x20] sm:$0xff]   ;;  %v5524_v8 = vld [vmem:[%s5665_s29 + $0x10] sm:$0xff]  }
 0x42a   : > { %v2202_v9 = vmax.f32 %v4905_v22, %v5367_v54  ;;  %v2201_v10 = vmax.f32 %v4904_v39, %v5366_v44  ;;  %v2253_v63 = vpack.c.bf16 %v2236_v46, %v2235_v47  ;;  %v5525_v44 = vld [vmem:[%s5665_s29 + $0x8] sm:$0xff]  }
 0x42b   : > { %v5380_v61 = vpop.permute.xlu0 %5379  ;;  %v5385_v14 = vpop.permute.xlu1 %5384 }
 0x42c   : > { %v2234_v11 = vmax.f32 %v2202_v9, %v5377_v62  ;;  %v2233_v13 = vmax.f32 %v2201_v10, %v5376_v0  ;;  %v5382_v16 = vunpack.i.h.bf16 %v5380_v61  ;;  %v5381_v12 = vunpack.i.l.bf16 %v5380_v61  ;;  %4912 = vmatprep.subr.bf16.mxu1 %v2253_v63  ;;  %v5526_v62 = vld [vmem:[%s5665_s29] sm:$0xff]  }
 0x42d   : > { %4913 = vmatpush3.bf16.msra.mxu1 %v2253_v63  ;;  %v5387_v17 = vunpack.i.h.bf16 %v5385_v14  ;;  %v5386_v18 = vunpack.i.l.bf16 %v5385_v14 }
 0x42e   : > { %v2252_v15 = vpack.c.bf16 %v2234_v11, %v2233_v13  ;;  %v2200_v19 = vmax.f32 %v2139_v23, %v5382_v16  ;;  %v2199_v38 = vmax.f32 %v6046_v53, %v5381_v12 }
 0x430   : > { %4914 = vmatprep.subr.bf16.mxu1 %v2252_v15  ;;  %v2232_v42 = vmax.f32 %v2200_v19, %v5387_v17  ;;  %v2231_v40 = vmax.f32 %v2199_v38, %v5386_v18 }
 0x431   : > { %4915 = vmatpush3.bf16.msra.mxu1 %v2252_v15 }
 0x432   : > { %v2251_v20 = vpack.c.bf16 %v2232_v42, %v2231_v40 }
 0x434   : > { %4916 = vmatprep.subr.bf16.mxu1 %v2251_v20 }
 0x435   : > { %4917 = vmatpush3.bf16.msra.mxu1 %v2251_v20 }
 0x438   : > { %4919 = vmatmul.mubr.msk.bf16.vlgmr.msra.gmra.mxu1 %vm1696_vm3, %v5510_v36 }
 0x439   : > { %4922 = vmatprep.mubr.msk.bf16.mxu1 %vm1696_vm3, %v5511_v21 }
 0x440   : > { %4923 = vmatmul.mubr.msk.bf16.gmra.mxu1 %vm1696_vm3, %v5512_v50 }
 0x441   : > { %4926 = vmatprep.mubr.msk.bf16.mxu1 %vm1696_vm3, %v5513_v52 }
 0x448   : > { %4927 = vmatmul.mubr.msk.bf16.gmra.mxu1 %vm1696_vm3, %v5514_v60 }
 0x449   : > { %4934 = vmatprep.mubr.msk.bf16.mxu1 %vm1714_vm5, %v5515_v4 }
 0x4f8   : > { %v4920_v57 = vpop.f32.mrf.mxu1 }
 0x4fa   : > { %v2337_v39 = vpop.f32.mrf.mxu1 }
 0x4fc   : > { %v4921_v53 = vpop.f32.mrf.mxu1 }
 0x4fe   : > { %v2340_v22 = vpop.f32.mrf.mxu1 }
 0x500   : > { %v4924_v23 = vpop.f32.mrf.mxu1 }
 0x501   : > { %v2386_v26 = vmax.f32 %v4920_v57, %v4924_v23 }
 0x502   : > { %v2353_v24 = vpop.f32.mrf.mxu1 }
 0x503   : > { %v2384_v29 = vmax.f32 %v2337_v39, %v2353_v24 }
 0x504   : > { %v4925_v34 = vpop.f32.mrf.mxu1 }
 0x505   : > { %v2387_v27 = vmax.f32 %v4921_v53, %v4925_v34 }
 0x506   : > { %v2356_v48 = vpop.f32.mrf.mxu1 }
 0x507   : > { %v2385_v30 = vmax.f32 %v2340_v22, %v2356_v48  ;;  %v5527_v48 = vld [vmem:[%s5670_s3] sm:$0xff]  }
 0x508   : > { %v4928_v49 = vpop.f32.mrf.mxu1 }
 0x509   : > { %v2390_v31 = vmax.f32 %v2386_v26, %v4928_v49 }
 0x50a   : > { %v2369_v25 = vpop.f32.mrf.mxu1 }
 0x50b   : > { %v2388_v41 = vmax.f32 %v2384_v29, %v2369_v25 }
 0x50c   : > { %v4929_v28 = vpop.f32.mrf.mxu1 }
 0x50d   : > { %v2391_v43 = vmax.f32 %v2387_v27, %v4929_v28 }
 0x50e   : > { %v2372_v32 = vpop.f32.mrf.mxu1 }
 0x50f   : > { %v6072_v33 = vpack.c.bf16 %v2391_v43, %v2390_v31  ;;  %v2389_v35 = vmax.f32 %v2385_v30, %v2372_v32 }
 0x511   : > { %v6074_v45 = vpack.c.bf16 %v2389_v35, %v2388_v41  ;;  %4930 = vmatprep.subr.bf16.mxu1 %v6072_v33  ;;  %v5528_v41 = vld [vmem:[%s5670_s3 + $0x8] sm:$0xff]   ;;  %v5529_v35 = vld [vmem:[%s5670_s3 + $0x10] sm:$0xff]  }
 0x512   : > { %4931 = vmatpush3.bf16.msra.mxu1 %v6072_v33 }
 0x513   : > { %4932 = vmatprep.subr.bf16.mxu1 %v6074_v45 }
 0x516   : > { %4933 = vmatpush3.bf16.msra.mxu1 %v6074_v45 }
 0x517   : > { %4946 = vmatprep.subr.bf16.mxu1 %v5521_v1 }
 0x519   : > { %4935 = vmatmul.mubr.msk.bf16.vlgmr.msra.gmra.mxu1 %vm1714_vm5, %v5516_v55  ;;  %v5530_v55 = vld [vmem:[%s5670_s3 + $0x18] sm:$0xff]  }
 0x51a   : > { %4938 = vmatprep.mubr.msk.bf16.mxu1 %vm1714_vm5, %v5517_v56  ;;  %4947 = vmatpush3.bf16.msra.mxu1 %v5521_v1  ;;  %v5531_v56 = vld [vmem:[%s5670_s3 + $0x20] sm:$0xff]  }
 0x51b   : > { %4948 = vmatprep.subr.bf16.mxu1 %v5522_v2 }
 0x51e   : > { %4949 = vmatpush3.bf16.msra.mxu1 %v5522_v2  ;;  %v5535_v2 = vld [vmem:[%s5675_s8 + $0x18] sm:$0xff]  }
 0x51f   : > { %4950 = vmatprep.subr.bf16.mxu1 %v5523_v5 }
 0x521   : > { %4939 = vmatmul.mubr.msk.bf16.gmra.mxu1 %vm1714_vm5, %v5518_v58  ;;  %v5532_v58 = vld [vmem:[%s5670_s3 + $0x28] sm:$0xff]  }
 0x522   : > { %4942 = vmatprep.mubr.msk.bf16.mxu1 %vm1714_vm5, %v5519_v59  ;;  %4951 = vmatpush3.bf16.msra.mxu1 %v5523_v5  ;;  %v5533_v59 = vld [vmem:[%s5675_s8 + $0x28] sm:$0xff]  }
 0x523   : > { %4952 = vmatprep.subr.bf16.mxu1 %v5524_v8 }
 0x526   : > { %4953 = vmatpush3.bf16.msra.mxu1 %v5524_v8 }
 0x527   : > { %4954 = vmatprep.subr.bf16.mxu1 %v5525_v44 }
 0x529   : > { %4943 = vmatmul.mubr.msk.bf16.gmra.mxu1 %vm1714_vm5, %v5520_v37  ;;  %v5534_v37 = vld [vmem:[%s5675_s8 + $0x20] sm:$0xff]  }
 0x52a   : > { %4955 = vmatpush3.bf16.msra.mxu1 %v5525_v44 }
 0x52b   : > { %4956 = vmatprep.subr.bf16.mxu1 %v5526_v62 }
 0x52e   : > { %4957 = vmatpush3.bf16.msra.mxu1 %v5526_v62 }
 0x5d9   : > { %v4936_v3 = vpop.f32.mrf.mxu1 }
 0x5db   : > { %v2488_v6 = vpop.f32.mrf.mxu1 }
 0x5dd   : > { %v4937_v7 = vpop.f32.mrf.mxu1 }
 0x5df   : > { %v2491_v51 = vpop.f32.mrf.mxu1 }
 0x5e1   : > { %v4940_v54 = vpop.f32.mrf.mxu1 }
 0x5e3   : > { %v2504_v46 = vpop.f32.mrf.mxu1 }
 0x5e5   : > { %v4941_v47 = vpop.f32.mrf.mxu1 }
 0x5e6   : > { %v5388_v0 = vpack.i.bf16 %v4941_v47, %v4940_v54 }
 0x5e7   : > { %v2507_v9 = vpop.f32.mrf.mxu1 }
 0x5e8   : > { %v5393_v10 = vpack.i.bf16 %v2507_v9, %v2504_v46  ;;  %5389 = vrot.lane.b32.xlu1 %v5388_v0, %s5624_s7  ;;  %v5538_v46 = vld [vmem:[%s5675_s8] sm:$0xff]  }
 0x5e9   : > { %v4944_v61 = vpop.f32.mrf.mxu1 }
 0x5ea   : > { %5394 = vrot.lane.b32.xlu0 %v5393_v10, %s5624_s7 }
 0x5eb   : > { %v2520_v63 = vpop.f32.mrf.mxu1 }
 0x5ed   : > { %v4945_v11 = vpop.f32.mrf.mxu1 }
 0x5ee   : > { %v5403_v13 = vpack.i.bf16 %v4945_v11, %v4944_v61 }
 0x5ef   : > { %v2523_v14 = vpop.f32.mrf.mxu1 }
 0x5f0   : > { %v5398_v16 = vpack.i.bf16 %v2523_v14, %v2520_v63  ;;  %5404 = vrot.lane.b32.xlu1 %v5403_v13, %s5622_s1 }
 0x5f2   : > { %5399 = vrot.lane.b32.xlu0 %v5398_v16, %s5622_s1 }
 0x65a   : > { %v5390_v12 = vpop.permute.xlu1 %5389 }
 0x65b   : > { %v5392_v17 = vunpack.i.h.bf16 %v5390_v12  ;;  %v5391_v18 = vunpack.i.l.bf16 %v5390_v12 }
 0x65c   : > { %v5395_v15 = vpop.permute.xlu0 %5394 }
 0x65d   : > { %v5397_v19 = vunpack.i.h.bf16 %v5395_v15  ;;  %v5396_v38 = vunpack.i.l.bf16 %v5395_v15  ;;  %v2570_v21 = vsel %vm1714_vm5, %v4937_v7, %v5392_v17  ;;  %v2569_v50 = vsel %vm1714_vm5, %v4936_v3, %v5391_v18 }
 0x65f   : > { %v2568_v4 = vsel %vm1714_vm5, %v2491_v51, %v5397_v19  ;;  %v2567_v57 = vsel %vm1714_vm5, %v2488_v6, %v5396_v38  ;;  %v5536_v6 = vld [vmem:[%s5675_s8 + $0x10] sm:$0xff]   ;;  %v5537_v51 = vld [vmem:[%s5675_s8 + $0x8] sm:$0xff]  }
 0x662   : > { %v5405_v42 = vpop.permute.xlu1 %5404 }
 0x663   : > { %v5407_v40 = vunpack.i.h.bf16 %v5405_v42  ;;  %v5406_v20 = vunpack.i.l.bf16 %v5405_v42 }
 0x664   : > { %v5400_v36 = vpop.permute.xlu0 %5399 }
 0x665   : > { %v5402_v52 = vunpack.i.h.bf16 %v5400_v36  ;;  %v5401_v60 = vunpack.i.l.bf16 %v5400_v36  ;;  %v2574_v39 = vsel %vm1696_vm3, %v2570_v21, %v5407_v40  ;;  %v2573_v53 = vsel %vm1696_vm3, %v2569_v50, %v5406_v20 }
 0x666   : > { %v2576_v34 = vpack.c.bf16 %v2574_v39, %v2573_v53 }
 0x667   : > { %v2572_v22 = vsel %vm1696_vm3, %v2568_v4, %v5402_v52  ;;  %v2571_v23 = vsel %vm1696_vm3, %v2567_v57, %v5401_v60 }
 0x668   : > { %v2575_v24 = vpack.c.bf16 %v2572_v22, %v2571_v23 }
 0x66a   : > { %4958 = vmatprep.mubr.msk.bf16.mxu1 %vm1678_vm2, %v2575_v24  ;;  %v5625_v24 = vmov 0.0  }
 0x66b   : > { %4959 = vmatmul.mubr.msk.bf16.vlgmr.msra.gmra.mxu1 %vm1678_vm2, %v2576_v34  ;;  %4994 = vmatprep.subr.bf16.mxu0 %v5625_v24 }
 0x66c   : > { %4966 = vmatprep.mubr.msk.bf16.mxu1 %vm1714_vm5, %v5527_v48  ;;  %4998 = vmatprep.mubr.msk.bf16.mxu0 %vm5626_vm7, %v5625_v24  ;;  %v2686_v48 = vunpack.c.l.bf16 %v6072_v33 }
 0x72b   : > { %v4960_v49 = vpop.f32.mrf.mxu1 }
 0x72c   : > { %v2682_v27 = vmax.f32 %v4960_v49, 0.0 }
 0x72d   : > { %v2665_v25 = vpop.f32.mrf.mxu1 }
 0x72e   : > { %v2680_v30 = vmax.f32 %v2665_v25, 0.0 }
 0x72f   : > { %v4961_v26 = vpop.f32.mrf.mxu1 }
 0x730   : > { %v2683_v28 = vmax.f32 %v4961_v26, 0.0  ;;  %v2687_v26 = vunpack.c.h.bf16 %v6072_v33 }
 0x731   : > { %v2668_v29 = vpop.f32.mrf.mxu1 }
 0x732   : > { %v2689_v31 = vpack.c.bf16 %v2683_v28, %v2682_v27  ;;  %v2681_v43 = vmax.f32 %v2668_v29, 0.0  ;;  %v2684_v28 = vunpack.c.l.bf16 %v6074_v45 }
 0x734   : > { %v2688_v32 = vpack.c.bf16 %v2681_v43, %v2680_v30  ;;  %4962 = vmatprep.subr.bf16.mxu1 %v2689_v31  ;;  %v2685_v30 = vunpack.c.h.bf16 %v6074_v45  ;;  %v5539_v45 = vld [vmem:[%s5680_s14] sm:$0xff]  }
 0x735   : > { %4963 = vmatpush3.bf16.msra.mxu1 %v2689_v31 }
 0x736   : > { %4964 = vmatprep.subr.bf16.mxu1 %v2688_v32 }
 0x739   : > { %4965 = vmatpush3.bf16.msra.mxu1 %v2688_v32 }
 0x73a   : > { %4978 = vmatprep.subr.bf16.mxu1 %v5533_v59 }
 0x73c   : > { %4967 = vmatmul.mubr.msk.bf16.vlgmr.msra.gmra.mxu1 %vm1714_vm5, %v5528_v41 }
 0x73d   : > { %4970 = vmatprep.mubr.msk.bf16.mxu1 %vm1714_vm5, %v5529_v35  ;;  %4979 = vmatpush3.bf16.msra.mxu1 %v5533_v59  ;;  %v5540_v59 = vld [vmem:[%s5680_s14 + $0x8] sm:$0xff]  }
 0x73e   : > { %4980 = vmatprep.subr.bf16.mxu1 %v5534_v37 }
 0x741   : > { %4981 = vmatpush3.bf16.msra.mxu1 %v5534_v37  ;;  %v5541_v37 = vld [vmem:[%s5680_s14 + $0x10] sm:$0xff]  }
 0x742   : > { %4982 = vmatprep.subr.bf16.mxu1 %v5535_v2 }
 0x744   : > { %4971 = vmatmul.mubr.msk.bf16.gmra.mxu1 %vm1714_vm5, %v5530_v55 }
 0x745   : > { %4974 = vmatprep.mubr.msk.bf16.mxu1 %vm1714_vm5, %v5531_v56  ;;  %4983 = vmatpush3.bf16.msra.mxu1 %v5535_v2  ;;  %v5543_v2 = vld [vmem:[%s5685_s19 + $0x20] sm:$0xff]  }
 0x746   : > { %4984 = vmatprep.subr.bf16.mxu1 %v5536_v6 }
 0x749   : > { %4985 = vmatpush3.bf16.msra.mxu1 %v5536_v6 }
 0x74a   : > { %4986 = vmatprep.subr.bf16.mxu1 %v5537_v51 }
 0x74c   : > { %4975 = vmatmul.mubr.msk.bf16.gmra.mxu1 %vm1714_vm5, %v5532_v58 }
 0x74d   : > { %4987 = vmatpush3.bf16.msra.mxu1 %v5537_v51  ;;  %v5546_v51 = vld [vmem:[%s5685_s19 + $0x8] sm:$0xff]  }
 0x74e   : > { %4988 = vmatprep.subr.bf16.mxu1 %v5538_v46 }
 0x751   : > { %4989 = vmatpush3.bf16.msra.mxu1 %v5538_v46 }
 0x752   : > { %5026 = vmatprep.subr.bf16.mxu1 %v5625_v24 }
 0x7fc   : > { %v4968_v1 = vpop.f32.mrf.mxu1 }
 0x7fe   : > { %v2784_v3 = vpop.f32.mrf.mxu1 }
 0x800   : > { %v4969_v5 = vpop.f32.mrf.mxu1 }
 0x802   : > { %v2787_v7 = vpop.f32.mrf.mxu1 }
 0x804   : > { %v4972_v8 = vpop.f32.mrf.mxu1 }
 0x806   : > { %v2800_v54 = vpop.f32.mrf.mxu1 }
 0x808   : > { %v4973_v44 = vpop.f32.mrf.mxu1 }
 0x809   : > { %v5408_v47 = vpack.i.bf16 %v4973_v44, %v4972_v8 }
 0x80a   : > { %v2803_v62 = vpop.f32.mrf.mxu1 }
 0x80b   : > { %v5413_v0 = vpack.i.bf16 %v2803_v62, %v2800_v54  ;;  %5409 = vrot.lane.b32.xlu1 %v5408_v47, %s5624_s7  ;;  %v5547_v47 = vld [vmem:[%s5685_s19] sm:$0xff]  }
 0x80c   : > { %v4976_v9 = vpop.f32.mrf.mxu1 }
 0x80d   : > { %5414 = vrot.lane.b32.xlu0 %v5413_v0, %s5624_s7 }
 0x80e   : > { %v2816_v10 = vpop.f32.mrf.mxu1 }
 0x810   : > { %v4977_v61 = vpop.f32.mrf.mxu1 }
 0x811   : > { %v5423_v63 = vpack.i.bf16 %v4977_v61, %v4976_v9 }
 0x812   : > { %v2819_v11 = vpop.f32.mrf.mxu1 }
 0x813   : > { %v5418_v13 = vpack.i.bf16 %v2819_v11, %v2816_v10  ;;  %5424 = vrot.lane.b32.xlu1 %v5423_v63, %s5622_s1 }
 0x815   : > { %5419 = vrot.lane.b32.xlu0 %v5418_v13, %s5622_s1 }
 0x87d   : > { %v5410_v14 = vpop.permute.xlu1 %5409 }
 0x87e   : > { %v5412_v12 = vunpack.i.h.bf16 %v5410_v14  ;;  %v5411_v15 = vunpack.i.l.bf16 %v5410_v14 }
 0x87f   : > { %v5415_v16 = vpop.permute.xlu0 %5414 }
 0x880   : > { %v5417_v17 = vunpack.i.h.bf16 %v5415_v16  ;;  %v5416_v18 = vunpack.i.l.bf16 %v5415_v16  ;;  %v2866_v20 = vsel %vm1714_vm5, %v4969_v5, %v5412_v12  ;;  %v2865_v36 = vsel %vm1714_vm5, %v4968_v1, %v5411_v15  ;;  %v5542_v1 = vld [vmem:[%s5685_s19 + $0x28] sm:$0xff]  }
 0x882   : > { %v2864_v52 = vsel %vm1714_vm5, %v2787_v7, %v5417_v17  ;;  %v2863_v60 = vsel %vm1714_vm5, %v2784_v3, %v5416_v18  ;;  %v5544_v3 = vld [vmem:[%s5685_s19 + $0x18] sm:$0xff]   ;;  %v5545_v7 = vld [vmem:[%s5685_s19 + $0x10] sm:$0xff]  }
 0x885   : > { %v5425_v19 = vpop.permute.xlu1 %5424 }
 0x886   : > { %v5427_v38 = vunpack.i.h.bf16 %v5425_v19  ;;  %v5426_v42 = vunpack.i.l.bf16 %v5425_v19 }
 0x887   : > { %v5420_v40 = vpop.permute.xlu0 %5419 }
 0x888   : > { %v5422_v21 = vunpack.i.h.bf16 %v5420_v40  ;;  %v5421_v50 = vunpack.i.l.bf16 %v5420_v40  ;;  %v2870_v4 = vsel %vm1696_vm3, %v2866_v20, %v5427_v38  ;;  %v2869_v57 = vsel %vm1696_vm3, %v2865_v36, %v5426_v42  ;;  %v5548_v36 = vld [vmem:[%s5700_s6] sm:$0xff]  }
 0x889   : > { %v2872_v23 = vpack.c.bf16 %v2870_v4, %v2869_v57 }
 0x88a   : > { %v2868_v39 = vsel %vm1696_vm3, %v2864_v52, %v5422_v21  ;;  %v2867_v53 = vsel %vm1696_vm3, %v2863_v60, %v5421_v50 }
 0x88b   : > { %v2871_v22 = vpack.c.bf16 %v2868_v39, %v2867_v53  ;;  %v5549_v53 = vld [vmem:[%s5690_s24] sm:$0xff]  }
 0x88d   : > { %4990 = vmatprep.mubr.msk.bf16.mxu1 %vm1678_vm2, %v2871_v22  ;;  %v5550_v22 = vld [vmem:[%s5690_s24 + $0x8] sm:$0xff]  }
 0x88e   : > { %4991 = vmatmul.mubr.msk.bf16.vlgmr.msra.gmra.mxu1 %vm1678_vm2, %v2872_v23  ;;  %v5551_v23 = vld [vmem:[%s5690_s24 + $0x10] sm:$0xff]  }
 0x88f   : > { %5030 = vmatprep.mubr.msk.bf16.mxu1 %vm5626_vm7, %v5625_v24 }
 0x94e   : > { %v4992_v34 = vpop.f32.mrf.mxu1 }
 0x94f   : > { %v2970_v25 = vadd.f32 %v4992_v34, %v2686_v48  ;;  %v5552_v34 = vld [vmem:[%s5705_s12 + $0x8] sm:$0xff]  }
 0x950   : > { %v2961_v49 = vpop.f32.mrf.mxu1 }
 0x951   : > { %v2978_v43 = vmax.f32 %v2970_v25, 0.0  ;;  %v2962_v32 = vadd.f32 %v2961_v49, %v2684_v28  ;;  %v5553_v25 = vld [vmem:[%s5705_s12] sm:$0xff]  }
 0x952   : > { %v4993_v27 = vpop.f32.mrf.mxu1 }
 0x953   : > { %v2973_v29 = vadd.f32 %v4993_v27, %v2687_v26  ;;  %v2976_v58 = vmax.f32 %v2962_v32, 0.0 }
 0x954   : > { %v2964_v31 = vpop.f32.mrf.mxu1 }
 0x955   : > { %v2979_v41 = vmax.f32 %v2973_v29, 0.0  ;;  %v2965_v35 = vadd.f32 %v2964_v31, %v2685_v30  ;;  %v5554_v29 = vld [vmem:[%s6358_s10 + $0x28] sm:$0xff]   ;;  %v5555_v30 = vld [vmem:[%s6358_s10 + $0x20] sm:$0xff]   ;;  %v5556_v31 = vld [vmem:[%s6358_s10 + $0x18] sm:$0xff]  }
 0x957   : > { %v2981_v55 = vpack.c.bf16 %v2979_v41, %v2978_v43  ;;  %v2977_v56 = vmax.f32 %v2965_v35, 0.0  ;;  %v5557_v41 = vld [vmem:[%s6358_s10 + $0x10] sm:$0xff]  }
 0x959   : > { %4995 = vmatpush3.bf16.msra.mxu0 %v2981_v55  ;;  %5027 = vmatpush3.bf16.msra.mxu1 %v2981_v55  ;;  %v2980_v33 = vpack.c.bf16 %v2977_v56, %v2976_v58  ;;  %v5558_v55 = vld [vmem:[%s6358_s10 + $0x8] sm:$0xff]  }
 0x95a   : > { %4996 = vmatprep.subr.bf16.mxu0 %v5625_v24  ;;  %5028 = vmatprep.subr.bf16.mxu1 %v5625_v24 }
 0x95d   : > { %4997 = vmatpush3.bf16.msra.mxu0 %v2980_v33  ;;  %5029 = vmatpush3.bf16.msra.mxu1 %v2980_v33 }
 0x95e   : > { %5010 = vmatprep.subr.bf16.mxu0 %v5625_v24  ;;  %5042 = vmatprep.subr.bf16.mxu1 %v5625_v24 }
 0x960   : > { %4999 = vmatmul.mubr.msk.bf16.vlgmr.msra.gmra.mxu0 %vm1714_vm5, %v5539_v45  ;;  %5031 = vmatmul.mubr.msk.bf16.vlgmr.msra.gmra.mxu1 %vm1714_vm5, %v5548_v36  ;;  %v5559_v45 = vld [vmem:[%s6358_s10] sm:$0xff]   ;;  %v5561_v36 = vld [vmem:[%s6360_s0 + $0x18] sm:$0xff]  }
 0x961   : > { %5002 = vmatprep.mubr.msk.bf16.mxu0 %vm5626_vm7, %v5625_v24  ;;  %5011 = vmatpush3.bf16.msra.mxu0 %v5542_v1 }
 0x962   : > { %5012 = vmatprep.subr.bf16.mxu0 %v5625_v24  ;;  %5044 = vmatprep.mubr.msk.bf16.mxu1 %vm5626_vm7, %v5625_v24 }
 0x965   : > { %5013 = vmatpush3.bf16.msra.mxu0 %v5543_v2 }
 0x966   : > { %5014 = vmatprep.subr.bf16.mxu0 %v5625_v24 }
 0x968   : > { %5003 = vmatmul.mubr.msk.bf16.gmra.mxu0 %vm1714_vm5, %v5540_v59 }
 0x969   : > { %5006 = vmatprep.mubr.msk.bf16.mxu0 %vm5626_vm7, %v5625_v24  ;;  %5015 = vmatpush3.bf16.msra.mxu0 %v5544_v3 }
 0x96a   : > { %5016 = vmatprep.subr.bf16.mxu0 %v5625_v24 }
 0x96d   : > { %5017 = vmatpush3.bf16.msra.mxu0 %v5545_v7 }
 0x96e   : > { %5018 = vmatprep.subr.bf16.mxu0 %v5625_v24 }
 0x970   : > { %5007 = vmatmul.mubr.msk.bf16.gmra.mxu0 %vm1714_vm5, %v5541_v37 }
 0x971   : > { %5022 = vmatprep.mubr.msk.bf16.mxu0 %vm5626_vm7, %v5625_v24  ;;  %5019 = vmatpush3.bf16.msra.mxu0 %v5546_v51 }
 0x972   : > { %5020 = vmatprep.subr.bf16.mxu0 %v5625_v24 }
 0x975   : > { %5021 = vmatpush3.bf16.msra.mxu0 %v5547_v47 }
 0x976   : > { %5034 = vmatprep.subr.bf16.mxu0 %v5625_v24 }
 0xa20   : > { %v3046_v5 = vpop.f32.mrf.mxu0  ;;  %v3228_v48 = vpop.f32.mrf.mxu1 }
 0xa22   : > { %v5000_v6 = vpop.f32.mrf.mxu0  ;;  %v5032_v49 = vpop.f32.mrf.mxu1 }
 0xa23   : > { %v5566_v49 = vld [vmem:[%s6362_s22] sm:$0xff]  }
 0xa24   : > { %v3049_v8 = vpop.f32.mrf.mxu0  ;;  %v3231_v26 = vpop.f32.mrf.mxu1 }
 0xa25   : > { %v3235_v27 = vpack.c.bf16 %v3231_v26, %v3228_v48  ;;  %v5565_v48 = vld [vmem:[%s6362_s22 + $0x8] sm:$0xff]  }
 0xa26   : > { %v5001_v54 = vpop.f32.mrf.mxu0  ;;  %v5033_v28 = vpop.f32.mrf.mxu1 }
 0xa28   : > { %v3054_v44 = vpop.f32.mrf.mxu0 }
 0xa2a   : > { %v5004_v46 = vpop.f32.mrf.mxu0 }
 0xa2c   : > { %v3057_v62 = vpop.f32.mrf.mxu0 }
 0xa2d   : > { %v5428_v0 = vpack.i.bf16 %v3057_v62, %v3054_v44 }
 0xa2e   : > { %v5005_v9 = vpop.f32.mrf.mxu0 }
 0xa2f   : > { %5429 = vrot.lane.b32.xlu0 %v5428_v0, %s5624_s7 }
 0xa30   : > { %v3062_v10 = vpop.f32.mrf.mxu0 }
 0xa32   : > { %v5008_v61 = vpop.f32.mrf.mxu0 }
 0xa34   : > { %v3065_v63 = vpop.f32.mrf.mxu0 }
 0xa35   : > { %v5433_v11 = vpack.i.bf16 %v3065_v63, %v3062_v10 }
 0xa36   : > { %v5009_v13 = vpop.f32.mrf.mxu0 }
 0xa37   : > { %5434 = vrot.lane.b32.xlu1 %v5433_v11, %s5622_s1 }
 0xaa1   : > { %v5430_v14 = vpop.permute.xlu0 %5429 }
 0xaa2   : > { %v5432_v16 = vunpack.i.h.bf16 %v5430_v14  ;;  %v5431_v12 = vunpack.i.l.bf16 %v5430_v14 }
 0xaa4   : > { %v3086_v19 = vsel %vm1714_vm5, %v3049_v8, %v5432_v16  ;;  %v3085_v38 = vsel %vm1714_vm5, %v3046_v5, %v5431_v12 }
 0xaa9   : > { %v5435_v15 = vpop.permute.xlu1 %5434 }
 0xaaa   : > { %v5437_v17 = vunpack.i.h.bf16 %v5435_v15  ;;  %v5436_v18 = vunpack.i.l.bf16 %v5435_v15 }
 0xaac   : > { %v3088_v42 = vsel %vm1696_vm3, %v3086_v19, %v5437_v17  ;;  %v3087_v40 = vsel %vm1696_vm3, %v3085_v38, %v5436_v18 }
 0xaad   : > { %v3089_v20 = vpack.c.bf16 %v3088_v42, %v3087_v40 }
 0xaaf   : > { %5023 = vmatmul.mubr.msk.bf16.vlgmr.msra.gmra.mxu0 %vm1678_vm2, %v3089_v20  ;;  %v5560_v20 = vld [vmem:[%s6359_s11] sm:$0xff]   ;;  %s6369_s11 = sld [smem:[#allocation12_spill]] }
 0xab0   : > { %5038 = vmatprep.mubr.msk.bf16.mxu0 %vm5626_vm7, %v5625_v24  ;;  %5035 = vmatpush3.bf16.msra.mxu0 %v5552_v34  ;;  %v3633_v34 = vld [vmem:[%s6361_s18] sm:$0xf]  ;;  %s6370_s18 = sld [smem:[#allocation11_spill]] }
 0xab1   : > { %5036 = vmatprep.subr.bf16.mxu0 %v5625_v24 }
 0xab4   : > { %5037 = vmatpush3.bf16.msra.mxu0 %v5553_v25 }
 0xab5   : > { %5056 = vmatprep.subr.bf16.mxu0 %v5625_v24 }
 0xab7   : > { %5039 = vmatmul.mubr.msk.bf16.vlgmr.msra.gmra.mxu0 %vm1714_vm5, %v3235_v27 }
 0xab8   : > { %5068 = vmatprep.mubr.msk.bf16.mxu0 %vm5626_vm7, %v5625_v24  ;;  %5057 = vmatpush3.bf16.msra.mxu0 %v5554_v29 }
 0xab9   : > { %5058 = vmatprep.subr.bf16.mxu0 %v5625_v24 }
 0xabc   : > { %5059 = vmatpush3.bf16.msra.mxu0 %v5555_v30 }
 0xabd   : > { %5060 = vmatprep.subr.bf16.mxu0 %v5625_v24 }
 0xac0   : > { %5061 = vmatpush3.bf16.msra.mxu0 %v5556_v31 }
 0xac1   : > { %5062 = vmatprep.subr.bf16.mxu0 %v5625_v24 }
 0xac4   : > { %5063 = vmatpush3.bf16.msra.mxu0 %v5557_v41  ;;  %v5567_v41 = vld [vmem:[%s6364_s26 + $0x8] sm:$0xff]  }
 0xac5   : > { %5064 = vmatprep.subr.bf16.mxu0 %v5625_v24 }
 0xac8   : > { %5065 = vmatpush3.bf16.msra.mxu0 %v5558_v55 }
 0xac9   : > { %5066 = vmatprep.subr.bf16.mxu0 %v5625_v24 }
 0xacc   : > { %5067 = vmatpush3.bf16.msra.mxu0 %v5559_v45 }
 0xacd   : > { %5078 = vmatprep.subr.bf16.mxu0 %v5625_v24 }
 0xb6f   : > { %v3175_v21 = vpop.f32.mrf.mxu0 }
 0xb70   : > { %v3182_v60 = vmax.f32 %v3175_v21, 0.0  ;;  %v5562_v21 = vld [vmem:[%s6360_s0 + $0x10] sm:$0xff]  }
 0xb71   : > { %v5024_v50 = vpop.f32.mrf.mxu0 }
 0xb72   : > { %v5563_v50 = vld [vmem:[%s6360_s0 + $0x8] sm:$0xff]  }
 0xb73   : > { %v3178_v52 = vpop.f32.mrf.mxu0 }
 0xb74   : > { %v3183_v4 = vmax.f32 %v3178_v52, 0.0  ;;  %v5564_v52 = vld [vmem:[%s6360_s0] sm:$0xff]  }
 0xb75   : > { %v5025_v57 = vpop.f32.mrf.mxu0 }
 0xb76   : > { %v3296_v39 = vpack.c.bf16 %v3183_v4, %v3182_v60 }
 0xb77   : > { %v3289_v8 = vpop.f32.mrf.mxu0 }
 0xb78   : > { %5043 = vmatpush3.bf16.msra.mxu1 %v3296_v39 }
 0xb79   : > { %5072 = vmatprep.subr.bf16.mxu1 %v5625_v24  ;;  %v5040_v51 = vpop.f32.mrf.mxu0 }
 0xb7b   : > { %5045 = vmatmul.mubr.msk.bf16.vlgmr.msra.gmra.mxu1 %vm1687_vm1, %v5549_v53  ;;  %v3292_v54 = vpop.f32.mrf.mxu0 }
 0xb7c   : > { %5048 = vmatprep.mubr.msk.bf16.mxu1 %vm5626_vm7, %v5625_v24 }
 0xb7d   : > { %v5041_v44 = vpop.f32.mrf.mxu0 }
 0xb83   : > { %5049 = vmatmul.mubr.msk.bf16.gmra.mxu1 %vm1687_vm1, %v5550_v22 }
 0xb84   : > { %5052 = vmatprep.mubr.msk.bf16.mxu1 %vm5626_vm7, %v5625_v24 }
 0xb8b   : > { %5053 = vmatmul.mubr.msk.bf16.gmra.mxu1 %vm1687_vm1, %v5551_v23 }
 0xb8c   : > { %5074 = vmatprep.mubr.msk.bf16.mxu1 %vm5626_vm7, %v5625_v24 }
 0xc3b   : > { %v3361_v43 = vpop.f32.mrf.mxu1 }
 0xc3d   : > { %v5046_v32 = vpop.f32.mrf.mxu1 }
 0xc3f   : > { %v3364_v35 = vpop.f32.mrf.mxu1 }
 0xc41   : > { %v5047_v56 = vpop.f32.mrf.mxu1 }
 0xc43   : > { %v3369_v58 = vpop.f32.mrf.mxu1 }
 0xc45   : > { %v5050_v33 = vpop.f32.mrf.mxu1 }
 0xc46   : > { %v5568_v33 = vld [vmem:[%s6364_s26] sm:$0xff]  }
 0xc47   : > { %v3372_v59 = vpop.f32.mrf.mxu1 }
 0xc48   : > { %v5438_v37 = vpack.i.bf16 %v3372_v59, %v3369_v58 }
 0xc49   : > { %v5051_v1 = vpop.f32.mrf.mxu1 }
 0xc4a   : > { %5439 = vrot.lane.b32.xlu0 %v5438_v37, %s5624_s7 }
 0xc4b   : > { %v3377_v2 = vpop.f32.mrf.mxu1 }
 0xc4d   : > { %v5054_v3 = vpop.f32.mrf.mxu1 }
 0xc4f   : > { %v3380_v5 = vpop.f32.mrf.mxu1 }
 0xc50   : > { %v5443_v6 = vpack.i.bf16 %v3380_v5, %v3377_v2 }
 0xc51   : > { %v5055_v7 = vpop.f32.mrf.mxu1 }
 0xc52   : > { %5444 = vrot.lane.b32.xlu1 %v5443_v6, %s5622_s1  ;;  %s6366_s1 = sld [smem:[#allocation9_spill]] }
 0xcbc   : > { %v5440_v46 = vpop.permute.xlu0 %5439 }
 0xcbd   : > { %v5442_v47 = vunpack.i.h.bf16 %v5440_v46  ;;  %v5441_v62 = vunpack.i.l.bf16 %v5440_v46 }
 0xcbf   : > { %v3401_v61 = vsel %vm1714_vm5, %v3364_v35, %v5442_v47  ;;  %v3400_v63 = vsel %vm1714_vm5, %v3361_v43, %v5441_v62  ;;  %v3738_v43 = vld [vmem:[%s6363_s23] sm:$0xf]  ;;  %s4408_s23 = sshll.u32 %s6374_s16, 3 }
 0xcc4   : > { %v5445_v0 = vpop.permute.xlu1 %5444 }
 0xcc5   : > { %v5447_v9 = vunpack.i.h.bf16 %v5445_v0  ;;  %v5446_v10 = vunpack.i.l.bf16 %v5445_v0 }
 0xcc7   : > { %v3403_v11 = vsel %vm1696_vm3, %v3401_v61, %v5447_v9  ;;  %v3402_v13 = vsel %vm1696_vm3, %v3400_v63, %v5446_v10  ;;  %v3849_v10 = vld [vmem:[%s6366_s1] sm:$0xf]  ;;  %s930_s1 = scalar_lea.vmem %s5785_s30, %s4408_s23 }
 0xcc8   : > { %v3404_v14 = vpack.c.bf16 %v3403_v11, %v3402_v13  ;;  %v5570_v61 = vld [vmem:[%s6365_s28] sm:$0xff]  }
 0xcc9   : > { %v3957_v63 = vld [vmem:[%s6367_s2] sm:$0xf] }
 0xcca   : > { %5069 = vmatmul.mubr.msk.bf16.vlgmr.msra.gmra.mxu0 %vm1678_vm2, %v3404_v14 }
 0xccb   : > { %5086 = vmatprep.mubr.msk.bf16.mxu0 %vm5626_vm7, %v5625_v24  ;;  %5079 = vmatpush3.bf16.msra.mxu0 %v5561_v36  ;;  %v5574_v36 = vld [vmem:[%s6369_s11 + $0x10] sm:$0xff]  }
 0xccc   : > { %5080 = vmatprep.subr.bf16.mxu0 %v5625_v24 }
 0xccf   : > { %5081 = vmatpush3.bf16.msra.mxu0 %v5562_v21  ;;  %v5575_v21 = vld [vmem:[%s6369_s11 + $0x8] sm:$0xff]  }
 0xcd0   : > { %5082 = vmatprep.subr.bf16.mxu0 %v5625_v24 }
 0xcd3   : > { %5083 = vmatpush3.bf16.msra.mxu0 %v5563_v50 }
 0xcd4   : > { %5084 = vmatprep.subr.bf16.mxu0 %v5625_v24 }
 0xcd7   : > { %5085 = vmatpush3.bf16.msra.mxu0 %v5564_v52 }
 0xcd8   : > { %5104 = vmatprep.subr.bf16.mxu0 %v5625_v24 }
 0xd8a   : > { %v3490_v16 = vpop.f32.mrf.mxu0 }
 0xd8b   : > { %v3491_v15 = vadd.f32 %v3490_v16, %v3289_v8  ;;  %v5569_v8 = vld [vmem:[%s6365_s28 + $0x8] sm:$0xff]  }
 0xd8c   : > { %v5070_v12 = vpop.f32.mrf.mxu0 }
 0xd8d   : > { %v3497_v38 = vmax.f32 %v3491_v15, 0.0 }
 0xd8e   : > { %v3493_v17 = vpop.f32.mrf.mxu0 }
 0xd8f   : > { %v3494_v18 = vadd.f32 %v3493_v17, %v3292_v54 }
 0xd90   : > { %v5071_v19 = vpop.f32.mrf.mxu0 }
 0xd91   : > { %v3498_v42 = vmax.f32 %v3494_v18, 0.0 }
 0xd93   : > { %v3499_v40 = vpack.c.bf16 %v3498_v42, %v3497_v38 }
 0xd95   : > { %5073 = vmatpush3.bf16.msra.mxu1 %v3499_v40 }
 0xd96   : > { %5090 = vmatprep.subr.bf16.mxu1 %v5625_v24 }
 0xd98   : > { %5075 = vmatmul.mubr.msk.bf16.vlgmr.msra.gmra.mxu1 %vm1687_vm1, %v5560_v20 }
 0xd99   : > { %5091 = vmatpush3.bf16.msra.mxu1 %v3499_v40  ;;  %5092 = vmatprep.mubr.msk.bf16.mxu1 %vm5626_vm7, %v5625_v24  ;;  %v5573_v40 = vld [vmem:[%s6369_s11 + $0x18] sm:$0xff]  }
 0xd9a   : > { %5096 = vmatprep.subr.bf16.mxu1 %v5625_v24 }
 0xda0   : > { %5093 = vmatmul.mubr.msk.bf16.vlgmr.msra.gmra.mxu1 %vm1687_vm1, %v3633_v34 }
 0xda1   : > { %5100 = vmatprep.mubr.msk.bf16.mxu1 %vm5626_vm7, %v5625_v24  ;;  %5097 = vmatpush3.bf16.msra.mxu1 %v5565_v48 }
 0xda2   : > { %5098 = vmatprep.subr.bf16.mxu1 %v5625_v24 }
 0xda5   : > { %5099 = vmatpush3.bf16.msra.mxu1 %v5566_v49 }
 0xda6   : > { %5110 = vmatprep.subr.bf16.mxu1 %v5625_v24 }
 0xe58   : > { %v3544_v60 = vpop.f32.mrf.mxu1 }
 0xe5a   : > { %v5076_v4 = vpop.f32.mrf.mxu1 }
 0xe5c   : > { %v3547_v57 = vpop.f32.mrf.mxu1 }
 0xe5d   : > { %3552 = vrot.lane.b32.xlu0 %v3547_v57, %s5624_s7  ;;  %s6368_s7 = sld [smem:[#allocation14_spill]] }
 0xe5e   : > { %v5077_v39 = vpop.f32.mrf.mxu1 }
 0xe60   : > { %v3671_v32 = vpop.f32.mrf.mxu1 }
 0xe61   : > { %v3677_v35 = vpack.c.bf16 %v3671_v32, %v3671_v32 }
 0xe62   : > { %v5094_v55 = vpop.f32.mrf.mxu1 }
 0xe63   : > { %5101 = vmatmul.mubr.msk.bf16.vlgmr.msra.gmra.mxu1 %vm1714_vm5, %v3677_v35  ;;  %v5571_v15 = vld [vmem:[%s6368_s7 + $0x8] sm:$0xff]   ;;  %v5572_v18 = vld [vmem:[%s6368_s7] sm:$0xff]  }
 0xe64   : > { %5111 = vmatpush3.bf16.msra.mxu1 %v5567_v41  ;;  %5114 = vmatprep.mubr.msk.bf16.mxu1 %vm5626_vm7, %v5625_v24  ;;  %v3674_v56 = vpop.f32.mrf.mxu1 }
 0xe65   : > { %5112 = vmatprep.subr.bf16.mxu1 %v5625_v24 }
 0xe66   : > { %v5095_v58 = vpop.f32.mrf.mxu1 }
 0xe68   : > { %5113 = vmatpush3.bf16.msra.mxu1 %v5568_v33  ;;  %v4187_v33 = vld [vmem:[%s5770_s20] sm:$0xf] }
 0xe69   : > { %5124 = vmatprep.subr.bf16.mxu1 %v5625_v24 }
 0xecf   : > { %v3553_v53 = vpop.permute.xlu0 %3552 }
 0xed0   : > { %v3555_v22 = vsel %vm1714_vm5, %v3544_v60, %v3553_v53  ;;  %v4062_v53 = vld [vmem:[%s6370_s18] sm:$0xf] }
 0xed1   : > { %v3556_v23 = vpack.c.bf16 %v3555_v22, %v3555_v22 }
 0xed3   : > { %5087 = vmatmul.mubr.msk.bf16.vlgmr.msra.gmra.mxu0 %vm1696_vm3, %v3556_v23  ;;  %v5576_v23 = vld [vmem:[%s6369_s11] sm:$0xff]  }
 0xed4   : > { %5106 = vmatprep.mubr.msk.bf16.mxu0 %vm5626_vm7, %v5625_v24 }
 0xf23   : > { %v3731_v3 = vpop.f32.mrf.mxu1 }
 0xf25   : > { %v5102_v5 = vpop.f32.mrf.mxu1 }
 0xf27   : > { %v3734_v6 = vpop.f32.mrf.mxu1 }
 0xf29   : > { %v5103_v7 = vpop.f32.mrf.mxu1 }
 0xf93   : > { %v3626_v25 = vpop.f32.mrf.mxu0 }
 0xf94   : > { %v3632_v26 = vmax.f32 %v3626_v25, 0.0 }
 0xf95   : > { %v5088_v27 = vpop.f32.mrf.mxu0 }
 0xf96   : > { %v3737_v28 = vpack.c.bf16 %v3632_v26, %v3632_v26 }
 0xf97   : > { %v3629_v29 = vpop.f32.mrf.mxu0 }
 0xf98   : > { %v3745_v30 = vsel %vm3743_vm8, %v3737_v28, 0 }
 0xf99   : > { %v5089_v31 = vpop.f32.mrf.mxu0  ;;  %5105 = vmatpush3.bf16.msra.mxu0 %v3745_v30 }
 0xf9a   : > { %5118 = vmatprep.subr.bf16.mxu0 %v5625_v24 }
 0xf9c   : > { %5107 = vmatmul.mubr.msk.bf16.vlgmr.msra.gmra.mxu0 %vm3739_vm9, %v3738_v43 }
 0xf9d   : > { %5120 = vmatprep.mubr.msk.bf16.mxu0 %vm5626_vm7, %v5625_v24 }
0x105c   : > { %v3781_v45 = vpop.f32.mrf.mxu0 }
0x105d   : > { %v3787_v59 = vpack.c.bf16 %v3781_v45, %v3781_v45  ;;  %v5577_v45 = vld [vmem:[%s5775_s27 + $0x18] sm:$0xff]  }
0x105e   : > { %v5108_v37 = vpop.f32.mrf.mxu0 }
0x105f   : > { %5115 = vmatmul.mubr.msk.bf16.vlgmr.msra.gmra.mxu1 %vm1714_vm5, %v3787_v59  ;;  %v5578_v59 = vld [vmem:[%s5775_s27 + $0x10] sm:$0xff]   ;;  %v5579_v37 = vld [vmem:[%s5775_s27 + $0x8] sm:$0xff]  }
0x1060   : > { %v3784_v1 = vpop.f32.mrf.mxu0  ;;  %5128 = vmatprep.mubr.msk.bf16.mxu1 %vm5626_vm7, %v5625_v24  ;;  %5125 = vmatpush3.bf16.msra.mxu1 %v5569_v8  ;;  %v4591_v8 = vld [vmem:[%s5780_s4] ss:$0 sm:$0xff] }
0x1061   : > { %5126 = vmatprep.subr.bf16.mxu1 %v5625_v24  ;;  %v5580_v1 = vld [vmem:[%s5775_s27] sm:$0xff]  }
0x1062   : > { %v5109_v2 = vpop.f32.mrf.mxu0 }
0x1064   : > { %5127 = vmatpush3.bf16.msra.mxu1 %v5570_v61 }
0x1065   : > { %5138 = vmatprep.subr.bf16.mxu1 %v5625_v24 }
0x111f   : > { %v3841_v51 = vpop.f32.mrf.mxu1 }
0x1120   : > { %v3842_v54 = vadd.f32 %v3841_v51, %v3731_v3 }
0x1121   : > { %v5116_v44 = vpop.f32.mrf.mxu1 }
0x1122   : > { %v3847_v46 = vmax.f32 %v3842_v54, 0.0 }
0x1123   : > { %v3844_v47 = vpop.f32.mrf.mxu1 }
0x1124   : > { %v3848_v62 = vpack.c.bf16 %v3847_v46, %v3847_v46 }
0x1125   : > { %v5117_v0 = vpop.f32.mrf.mxu1 }
0x1126   : > { %v3854_v9 = vsel %vm3743_vm8, %v3848_v62, 0 }
0x1127   : > { %5119 = vmatpush3.bf16.msra.mxu0 %v3854_v9 }
0x1128   : > { %5132 = vmatprep.subr.bf16.mxu0 %v5625_v24 }
0x112a   : > { %5121 = vmatmul.mubr.msk.bf16.vlgmr.msra.gmra.mxu0 %vm3739_vm9, %v3849_v10 }
0x112b   : > { %5133 = vmatpush3.bf16.msra.mxu0 %v3854_v9  ;;  %5134 = vmatprep.mubr.msk.bf16.mxu0 %vm5626_vm7, %v5625_v24 }
0x112c   : > { %5146 = vmatprep.subr.bf16.mxu0 %v5625_v24 }
0x1132   : > { %5135 = vmatmul.mubr.msk.bf16.vlgmr.msra.gmra.mxu0 %vm3739_vm9, %v3957_v63 }
0x1133   : > { %5148 = vmatprep.mubr.msk.bf16.mxu0 %vm5626_vm7, %v5625_v24 }
0x11ea   : > { %v3890_v11 = vpop.f32.mrf.mxu0 }
0x11eb   : > { %v3896_v13 = vpack.c.bf16 %v3890_v11, %v3890_v11 }
0x11ec   : > { %v5122_v14 = vpop.f32.mrf.mxu0 }
0x11ed   : > { %5129 = vmatmul.mubr.msk.bf16.vlgmr.msra.gmra.mxu1 %vm1714_vm5, %v3896_v13 }
0x11ee   : > { %v3893_v16 = vpop.f32.mrf.mxu0  ;;  %5142 = vmatprep.mubr.msk.bf16.mxu1 %vm5626_vm7, %v5625_v24  ;;  %5139 = vmatpush3.bf16.msra.mxu1 %v5571_v15 }
0x11ef   : > { %5140 = vmatprep.subr.bf16.mxu1 %v5625_v24 }
0x11f0   : > { %v5123_v12 = vpop.f32.mrf.mxu0 }
0x11f2   : > { %v3995_v17 = vpop.f32.mrf.mxu0  ;;  %5141 = vmatpush3.bf16.msra.mxu1 %v5572_v18 }
0x11f3   : > { %v4001_v42 = vpack.c.bf16 %v3995_v17, %v3995_v17  ;;  %5152 = vmatprep.subr.bf16.mxu1 %v5625_v24 }
0x11f4   : > { %v5136_v19 = vpop.f32.mrf.mxu0 }
0x11f5   : > { %5143 = vmatmul.mubr.msk.bf16.vlgmr.msra.gmra.mxu1 %vm1714_vm5, %v4001_v42 }
0x11f6   : > { %v3998_v38 = vpop.f32.mrf.mxu0  ;;  %5153 = vmatpush3.bf16.msra.mxu1 %v5573_v40  ;;  %5160 = vmatprep.mubr.msk.bf16.mxu1 %vm5626_vm7, %v5625_v24 }
0x11f7   : > { %5154 = vmatprep.subr.bf16.mxu1 %v5625_v24 }
0x11f8   : > { %v5137_v20 = vpop.f32.mrf.mxu0 }
0x11fa   : > { %5155 = vmatpush3.bf16.msra.mxu1 %v5574_v36 }
0x11fb   : > { %5156 = vmatprep.subr.bf16.mxu1 %v5625_v24 }
0x11fe   : > { %5157 = vmatpush3.bf16.msra.mxu1 %v5575_v21 }
0x11ff   : > { %5158 = vmatprep.subr.bf16.mxu1 %v5625_v24 }
0x1202   : > { %5159 = vmatpush3.bf16.msra.mxu1 %v5576_v23 }
0x12ad   : > { %v3950_v50 = vpop.f32.mrf.mxu1 }
0x12ae   : > { %v3956_v52 = vmax.f32 %v3950_v50, 0.0 }
0x12af   : > { %v5130_v60 = vpop.f32.mrf.mxu1 }
0x12b0   : > { %v4061_v4 = vpack.c.bf16 %v3956_v52, %v3956_v52 }
0x12b1   : > { %v3953_v57 = vpop.f32.mrf.mxu1 }
0x12b2   : > { %v4067_v39 = vsel %vm3743_vm8, %v4061_v4, 0 }
0x12b3   : > { %5147 = vmatpush3.bf16.msra.mxu0 %v4067_v39  ;;  %v5131_v22 = vpop.f32.mrf.mxu1 }
0x12b4   : > { %5164 = vmatprep.subr.bf16.mxu0 %v5625_v24 }
0x12b5   : > { %v4055_v34 = vpop.f32.mrf.mxu1 }
0x12b6   : > { %5149 = vmatmul.mubr.msk.bf16.vlgmr.msra.gmra.mxu0 %vm3739_vm9, %v4062_v53 }
0x12b7   : > { %5166 = vmatprep.mubr.msk.bf16.mxu0 %vm5626_vm7, %v5625_v24  ;;  %v5144_v48 = vpop.f32.mrf.mxu1 }
0x12b9   : > { %v4058_v49 = vpop.f32.mrf.mxu1 }
0x12bb   : > { %v5145_v25 = vpop.f32.mrf.mxu1 }
0x1376   : > { %v4103_v26 = vpop.f32.mrf.mxu0 }
0x1377   : > { %v4109_v27 = vpack.c.bf16 %v4103_v26, %v4103_v26 }
0x1378   : > { %v5150_v28 = vpop.f32.mrf.mxu0 }
0x1379   : > { %5161 = vmatmul.mubr.msk.bf16.vlgmr.msra.gmra.mxu1 %vm1696_vm3, %v4109_v27 }
0x137a   : > { %v4106_v29 = vpop.f32.mrf.mxu0 }
0x137c   : > { %v5151_v30 = vpop.f32.mrf.mxu0 }
0x1439   : > { %v4179_v31 = vpop.f32.mrf.mxu1 }
0x143a   : > { %v4180_v43 = vadd.f32 %v4179_v31, %v4055_v34 }
0x143b   : > { %v5162_v32 = vpop.f32.mrf.mxu1 }
0x143c   : > { %v4185_v41 = vmax.f32 %v4180_v43, 0.0 }
0x143d   : > { %v4182_v35 = vpop.f32.mrf.mxu1 }
0x143e   : > { %v4186_v55 = vpack.c.bf16 %v4185_v41, %v4185_v41 }
0x143f   : > { %v5163_v56 = vpop.f32.mrf.mxu1 }
0x1440   : > { %v4192_v58 = vsel %vm3743_vm8, %v4186_v55, 0 }
0x1441   : > { %5165 = vmatpush3.bf16.msra.mxu0 %v4192_v58 }
0x1442   : > { %5170 = vmatprep.subr.bf16.mxu0 %v5625_v24 }
0x1444   : > { %5167 = vmatmul.mubr.msk.bf16.vlgmr.msra.gmra.mxu0 %vm3739_vm9, %v4187_v33 }
0x1445   : > { %5171 = vmatpush3.bf16.msra.mxu0 %v5577_v45  ;;  %5178 = vmatprep.mubr.msk.bf16.mxu0 %vm5626_vm7, %v5625_v24 }
0x1446   : > { %5172 = vmatprep.subr.bf16.mxu0 %v5625_v24 }
0x1449   : > { %5173 = vmatpush3.bf16.msra.mxu0 %v5578_v59 }
0x144a   : > { %5174 = vmatprep.subr.bf16.mxu0 %v5625_v24 }
0x144d   : > { %5175 = vmatpush3.bf16.msra.mxu0 %v5579_v37 }
0x144e   : > { %5176 = vmatprep.subr.bf16.mxu0 %v5625_v24 }
0x1451   : > { %5177 = vmatpush3.bf16.msra.mxu0 %v5580_v1 }
0x1504   : > { %v4228_v2 = vpop.f32.mrf.mxu0 }
0x1505   : > { %v4234_v3 = vpack.c.bf16 %v4228_v2, %v4228_v2 }
0x1506   : > { %v5168_v5 = vpop.f32.mrf.mxu0 }
0x1507   : > { %5179 = vmatmul.mubr.msk.bf16.vlgmr.msra.gmra.mxu0 %vm1696_vm3, %v4234_v3 }
0x1508   : > { %v4231_v6 = vpop.f32.mrf.mxu0 }
0x150a   : > { %v5169_v7 = vpop.f32.mrf.mxu0 }
0x15c7   : > { %v4311_v51 = vpop.f32.mrf.mxu0 }
0x15c8   : > { %v4312_v54 = vadd.f32 %v4591_v8, %v4311_v51 }
0x15c9   : > { %v5180_v44 = vpop.f32.mrf.mxu0 }
0x15ca   : > { %4317 = vst [vmem:[%s930_s1] sm:$0xff] %v4312_v54 }
0x15cb   : > { %v4314_v46 = vpop.f32.mrf.mxu0 }
0x15cd   : > { %v5181_v24 = vpop.f32.mrf.mxu0 }
0x15ce PF: > { %s71_s15 = sadd.s32 1, %s5587_s15  }
0x15cf   : > { %p68_p5 = scmp.ge.s32.totalorder %s71_s15, 4  }
0x15d1   :  { %70 = sbr.rel (!%p68_p5) target bundleno = 48 (0x30), region = 200 }

</bundles_post_ra>
